<compile_context>
chip_gen: v7x
topology: tpu7x:2x2x1
jax: 0.10.0
libtpu: 0.0.40
codegen_flags: <defaults>
</compile_context>

<pallas_src>
import numpy as np
import jax
import jax.numpy as jnp
from jax.experimental import pallas as pl
from jax.experimental.pallas import tpu as pltpu

# ---------------- configuration (small synthetic shapes) ----------------
B = 2              # batch
C_IN = 4           # input channels
H = W = 16         # spatial
FEAT = 512         # backbone feature width (fixed by Linear(512, num_classes))
NUM_CLASSES = 10
KSZ = 3
HW = H * W
CK = C_IN * KSZ * KSZ       # 36   im2col contraction dim
CK_PAD = 128                # padded contraction dim (lane-dense, full MXU K)
NC_PAD = 128                # padded classifier width (lane-dense output stores)
B_PAD = 8                   # padded batch rows (sublane-aligned pooled output)

# average-pool matrix: row b averages the b-th HW-long segment of the fused batch.
# Built once at module scope (baked in as a compile-time constant operand).
_POOL_NP = np.zeros((B_PAD, B * HW), np.float32)
for _b in range(B):
    _POOL_NP[_b, _b * HW:(_b + 1) * HW] = 1.0 / HW


# ---------------- Pallas kernel (single invocation, everything VMEM-resident) ----------------
def distill_kernel(p_ref, wconv_ref, bconv_ref, pool_ref, wcls_ref, bcls_ref,
                   feat_ref, logit_ref):
    # p_ref:     (B*HW, CK_PAD)   im2col patches for the whole batch, zero-padded in K
    # wconv_ref: (CK_PAD, FEAT)   conv weight (im2col layout), zero-padded in K
    # bconv_ref: (1, FEAT)        conv bias
    # pool_ref:  (B_PAD, B*HW)    average-pool matrix (1/HW on each batch segment)
    # wcls_ref:  (FEAT, NC_PAD)   classifier weight (transposed, zero-padded in N)
    # bcls_ref:  (1, NC_PAD)      classifier bias (zero-padded)
    # feat_ref:  (B_PAD, FEAT)    pooled features (rows >= B are padding)
    # logit_ref: (B_PAD, NC_PAD)  logits (rows >= B / cols >= NUM_CLASSES are padding)

    # Conv as one MXU matmul over the fused batch, + bias, ReLU (VPU).
    conv = jnp.dot(p_ref[...], wconv_ref[...],
                   preferred_element_type=jnp.float32)          # (B*HW, FEAT)
    conv = jnp.maximum(conv + bconv_ref[...], 0.0)

    # Global average pool as a pooling-matrix matmul (reduction stays on the MXU,
    # no 512-deep cross-sublane XLU reduce).
    feat = jnp.dot(pool_ref[...], conv,
                   preferred_element_type=jnp.float32)          # (B_PAD, FEAT)
    feat_ref[...] = feat

    # Classifier: Linear(512, num_classes) with lane-dense padded N.
    logit_ref[...] = (jnp.dot(feat, wcls_ref[...],
                              preferred_element_type=jnp.float32)
                      + bcls_ref[...])                          # (B_PAD, NC_PAD)


def distill_forward(x, wconv, bconv, wcls, bcls):
    """x: (B, C_IN, H, W) float32 (NCHW, like PyTorch). Returns (feature, logits)."""
    # -------- glue: channels-last im2col (pad=1, k=3, stride=1), ordering [kh, kw, c] --------
    x_nhwc = jnp.transpose(x, (0, 2, 3, 1))                            # (B, H, W, C)
    xp = jnp.pad(x_nhwc, ((0, 0), (1, 1), (1, 1), (0, 0)))
    cols = [xp[:, i:i + H, j:j + W, :]
            for i in range(KSZ) for j in range(KSZ)]                   # each (B, H, W, C)
    patches = jnp.concatenate(cols, axis=-1).reshape(B * HW, CK)       # (B*HW, 36)
    patches = jnp.pad(patches, ((0, 0), (0, CK_PAD - CK)))             # (B*HW, 128)

    # conv weight (FEAT, Cin, 3, 3) -> [kh, kw, c] ordering -> (CK, FEAT), zero-pad K.
    wconv_mat = jnp.transpose(wconv, (2, 3, 1, 0)).reshape(CK, FEAT)
    wconv_mat = jnp.pad(wconv_mat, ((0, CK_PAD - CK), (0, 0)))         # (128, FEAT)
    bconv_row = bconv.reshape(1, FEAT)

    # classifier weight/bias, zero-padded to a lane-dense 128-wide N.
    wcls_mat = jnp.pad(wcls.T, ((0, 0), (0, NC_PAD - NUM_CLASSES)))    # (FEAT, 128)
    bcls_row = jnp.pad(bcls.reshape(1, NUM_CLASSES),
                       ((0, 0), (0, NC_PAD - NUM_CLASSES)))            # (1, 128)

    pool_mat = jnp.asarray(_POOL_NP)                                   # (B_PAD, B*HW)

    vmem = pl.BlockSpec(memory_space=pltpu.MemorySpace.VMEM)
    feat_pad, logit_pad = pl.pallas_call(
        distill_kernel,
        in_specs=[vmem] * 6,
        out_specs=(vmem, vmem),
        out_shape=(
            jax.ShapeDtypeStruct((B_PAD, FEAT), jnp.float32),
            jax.ShapeDtypeStruct((B_PAD, NC_PAD), jnp.float32),
        ),
        compiler_params=pltpu.CompilerParams(vmem_limit_bytes=32 * 1024 * 1024),
    )(patches, wconv_mat, bconv_row, pool_mat, wcls_mat, bcls_row)

    # Match PyTorch shapes: feature (B, 512, 1, 1) from avgpool, logits (B, num_classes).
    feature = feat_pad[:B].reshape(B, FEAT, 1, 1)
    logits = logit_pad[:B, :NUM_CLASSES]
    return feature, logits


def reference_forward(x, wconv, bconv, wcls, bcls):
    """Pure-JAX reference for correctness checking."""
    conv = jax.lax.conv_general_dilated(
        x, wconv, window_strides=(1, 1), padding="SAME",
        dimension_numbers=("NCHW", "OIHW", "NCHW"))
    conv = jnp.maximum(conv + bconv[None, :, None, None], 0.0)
    feat = jnp.mean(conv, axis=(2, 3))                                 # (B, FEAT)
    logits = feat @ wcls.T + bcls
    return feat.reshape(B, FEAT, 1, 1), logits


if __name__ == "__main__":
    key = jax.random.PRNGKey(0)
    kx, k1, k2, k3, k4 = jax.random.split(key, 5)

    x = jax.random.normal(kx, (B, C_IN, H, W), dtype=jnp.float32)
    wconv = jax.random.normal(k1, (FEAT, C_IN, KSZ, KSZ), dtype=jnp.float32) * 0.05
    bconv = jax.random.normal(k2, (FEAT,), dtype=jnp.float32) * 0.05
    wcls = jax.random.normal(k3, (NUM_CLASSES, FEAT), dtype=jnp.float32) * 0.05
    bcls = jax.random.normal(k4, (NUM_CLASSES,), dtype=jnp.float32) * 0.05

    feature, logits = jax.jit(distill_forward)(x, wconv, bconv, wcls, bcls)
    jax.block_until_ready((feature, logits))

    ref_feat, ref_logits = reference_forward(x, wconv, bconv, wcls, bcls)
    assert feature.shape == (B, FEAT, 1, 1) and logits.shape == (B, NUM_CLASSES)
    assert jnp.allclose(feature, ref_feat, atol=1e-3, rtol=1e-3)
    assert jnp.allclose(logits, ref_logits, atol=1e-3, rtol=1e-3)

    print("KERNEL_OK")
</pallas_src>

<mosaic_0001>
module attributes {stable_mosaic.version = 11 : i64} {
  func.func @distill_kernel(%arg0: memref<512x128xf32, #tpu.memory_space<vmem>>, %arg1: memref<128x512xf32, #tpu.memory_space<vmem>>, %arg2: memref<1x512xf32, #tpu.memory_space<vmem>>, %arg3: memref<8x512xf32, #tpu.memory_space<vmem>>, %arg4: memref<512x128xf32, #tpu.memory_space<vmem>>, %arg5: memref<1x128xf32, #tpu.memory_space<vmem>>, %arg6: memref<8x512xf32, #tpu.memory_space<vmem>>, %arg7: memref<8x128xf32, #tpu.memory_space<vmem>>) attributes {dimension_semantics = [], scalar_prefetch = 0 : i64, scratch_operands = 0 : i64, tpu.core_type = #tpu.core_type<tc>} {
    %c0 = arith.constant 0 : index
    %c0_0 = arith.constant 0 : index
    %0 = vector.load %arg0[%c0, %c0_0] : memref<512x128xf32, #tpu.memory_space<vmem>>, vector<512x128xf32>
    %c0_1 = arith.constant 0 : index
    %c0_2 = arith.constant 0 : index
    %1 = vector.load %arg1[%c0_1, %c0_2] : memref<128x512xf32, #tpu.memory_space<vmem>>, vector<128x512xf32>
    %cst = arith.constant dense<0.000000e+00> : vector<512x512xf32>
    %2 = tpu.matmul %0, %1, %cst {dimension_numbers = #tpu.dot_dimension_numbers<[1], [0], [0], [1], [0, 0, 1, 1], [], []>} : vector<512x128xf32>, vector<128x512xf32>, vector<512x512xf32> -> vector<512x512xf32>
    %c0_3 = arith.constant 0 : index
    %c0_4 = arith.constant 0 : index
    %3 = vector.load %arg2[%c0_3, %c0_4] : memref<1x512xf32, #tpu.memory_space<vmem>>, vector<1x512xf32>
    %4 = vector.broadcast %3 : vector<1x512xf32> to vector<512x512xf32>
    %5 = arith.addf %2, %4 : vector<512x512xf32>
    %cst_5 = arith.constant 0.000000e+00 : f32
    %6 = vector.broadcast %cst_5 : f32 to vector<512x512xf32>
    %7 = arith.maximumf %5, %6 : vector<512x512xf32>
    %c0_6 = arith.constant 0 : index
    %c0_7 = arith.constant 0 : index
    %8 = vector.load %arg3[%c0_6, %c0_7] : memref<8x512xf32, #tpu.memory_space<vmem>>, vector<8x512xf32>
    %cst_8 = arith.constant dense<0.000000e+00> : vector<8x512xf32>
    %9 = tpu.matmul %8, %7, %cst_8 {dimension_numbers = #tpu.dot_dimension_numbers<[1], [0], [0], [1], [0, 0, 1, 1], [], []>} : vector<8x512xf32>, vector<512x512xf32>, vector<8x512xf32> -> vector<8x512xf32>
    %c0_9 = arith.constant 0 : index
    %c0_10 = arith.constant 0 : index
    %10 = vector.load %arg6[%c0_9, %c0_10] : memref<8x512xf32, #tpu.memory_space<vmem>>, vector<8x512xf32>
    tpu.vector_store %arg6[%c0_9, %c0_10], %9 {strides = array<i32>} : memref<8x512xf32, #tpu.memory_space<vmem>>, vector<8x512xf32>,
    %c0_11 = arith.constant 0 : index
    %c0_12 = arith.constant 0 : index
    %11 = vector.load %arg4[%c0_11, %c0_12] : memref<512x128xf32, #tpu.memory_space<vmem>>, vector<512x128xf32>
    %cst_13 = arith.constant dense<0.000000e+00> : vector<8x128xf32>
    %12 = tpu.matmul %9, %11, %cst_13 {dimension_numbers = #tpu.dot_dimension_numbers<[1], [0], [0], [1], [0, 0, 1, 1], [], []>} : vector<8x512xf32>, vector<512x128xf32>, vector<8x128xf32> -> vector<8x128xf32>
    %c0_14 = arith.constant 0 : index
    %c0_15 = arith.constant 0 : index
    %13 = vector.load %arg5[%c0_14, %c0_15] : memref<1x128xf32, #tpu.memory_space<vmem>>, vector<1x128xf32>
    %14 = vector.broadcast %13 : vector<1x128xf32> to vector<8x128xf32>
    %15 = arith.addf %12, %14 : vector<8x128xf32>
    %c0_16 = arith.constant 0 : index
    %c0_17 = arith.constant 0 : index
    %16 = vector.load %arg7[%c0_16, %c0_17] : memref<8x128xf32, #tpu.memory_space<vmem>>, vector<8x128xf32>
    tpu.vector_store %arg7[%c0_16, %c0_17], %15 {strides = array<i32>} : memref<8x128xf32, #tpu.memory_space<vmem>>, vector<8x128xf32>,
    return
  }
}

</mosaic_0001>

<bundles_post_ra>
// kernel: distill_forward.1
= control target key start
LH: loop header
LB: loop body
LE: loop exit
PB: predicated region body
PF: predicated region fallthrough
CT: control target
= control target key end

     0   :  { %v2301_v3 = vmov 0.0   ;;  %s3343_s1 = inlined_call_operand.vmem [shape: f32[128,512], index: 1, kind: input, shape index: {}]   ;;  %s3344_s0 = inlined_call_operand.vmem [shape: f32[512,128], index: 0, kind: input, shape index: {}]   ;;  %s3345_s2 = inlined_call_operand.vmem [shape: f32[1,512], index: 2, kind: input, shape index: {}]   ;;  %s3346_s3 = inlined_call_operand.vmem [shape: f32[8,512], index: 3, kind: input, shape index: {}]   ;;  %s3347_s4 = inlined_call_operand.vmem [shape: f32[512,128], index: 4, kind: input, shape index: {}]   ;;  %s3348_s6 = inlined_call_operand.vmem [shape: f32[8,512], index: 6, kind: output, shape index: {0}]   ;;  %s3349_s5 = inlined_call_operand.vmem [shape: f32[1,128], index: 5, kind: input, shape index: {}]   ;;  %s3350_s7 = inlined_call_operand.vmem [shape: f32[8,128], index: 7, kind: output, shape index: {1}]  }
   0x1   :  { %v90_v0 = vld [vmem:[%s3343_s1 + $0x8] sm:$0xff]  ;;  %v92_v2 = vld [vmem:[%s3343_s1 + $0x18] sm:$0xff]  ;;  %239 = vmatprep.mubr.f32.mxu0 %v2301_v3  ;;  %688 = vmatprep.mubr.f32.mxu1 %v2301_v3  ;;  %v89_v6 = vld [vmem:[%s3343_s1] sm:$0xff] }
   0x2   :  { %v94_v1 = vld [vmem:[%s3343_s1 + $0x28] sm:$0xff]  ;;  %v96_v5 = vld [vmem:[%s3343_s1 + $0x38] sm:$0xff]  ;;  %v93_v7 = vld [vmem:[%s3343_s1 + $0x20] sm:$0xff] }
   0x3   :  { %v1912_v4 = vpack.c.bf16 %v94_v1, %v90_v0  ;;  %v1944_v8 = vpack.c.bf16 %v96_v5, %v92_v2  ;;  %v1914_v9 = vpack.c.bf16 %v93_v7, %v89_v6  ;;  %v91_v10 = vld [vmem:[%s3343_s1 + $0x10] sm:$0xff]  ;;  %v98_v12 = vld [vmem:[%s3343_s1 + $0x48] sm:$0xff]  ;;  %v100_v15 = vld [vmem:[%s3343_s1 + $0x58] sm:$0xff] }
   0x4   :  { %v95_v11 = vld [vmem:[%s3343_s1 + $0x30] sm:$0xff]  ;;  %v102_v14 = vld [vmem:[%s3343_s1 + $0x68] sm:$0xff]  ;;  %v104_v16 = vld [vmem:[%s3343_s1 + $0x78] sm:$0xff] }
   0x5   :  { %1913 = vmatprep.subr.bf16.mxu0 %v1912_v4  ;;  %v1946_v13 = vpack.c.bf16 %v95_v11, %v91_v10  ;;  %1945 = vmatprep.subr.bf16.mxu1 %v1944_v8  ;;  %v1916_v17 = vpack.c.bf16 %v102_v14, %v98_v12  ;;  %v1948_v18 = vpack.c.bf16 %v104_v16, %v100_v15  ;;  %v97_v19 = vld [vmem:[%s3343_s1 + $0x40] sm:$0xff]  ;;  %v99_v21 = vld [vmem:[%s3343_s1 + $0x50] sm:$0xff]  ;;  %v106_v24 = vld [vmem:[%s3343_s1 + $0x88] sm:$0xff] }
   0x6   :  { %1915 = vmatpush1.bf16.msra.mxu0 %v1914_v9  ;;  %v101_v20 = vld [vmem:[%s3343_s1 + $0x60] sm:$0xff]  ;;  %v103_v23 = vld [vmem:[%s3343_s1 + $0x70] sm:$0xff]  ;;  %v110_v25 = vld [vmem:[%s3343_s1 + $0xa8] sm:$0xff] }
   0x7   :  { %1947 = vmatpush1.bf16.msra.mxu1 %v1946_v13  ;;  %v1918_v22 = vpack.c.bf16 %v101_v20, %v97_v19  ;;  %1917 = vmatprep.subr.bf16.mxu0 %v1916_v17  ;;  %v1950_v26 = vpack.c.bf16 %v103_v23, %v99_v21  ;;  %v1920_v27 = vpack.c.bf16 %v110_v25, %v106_v24  ;;  %v108_v28 = vld [vmem:[%s3343_s1 + $0x98] sm:$0xff]  ;;  %v105_v30 = vld [vmem:[%s3343_s1 + $0x80] sm:$0xff]  ;;  %v107_v33 = vld [vmem:[%s3343_s1 + $0x90] sm:$0xff] }
   0x8   :  { %1949 = vmatprep.subr.bf16.mxu1 %v1948_v18  ;;  %v112_v29 = vld [vmem:[%s3343_s1 + $0xb8] sm:$0xff]  ;;  %v109_v32 = vld [vmem:[%s3343_s1 + $0xa0] sm:$0xff]  ;;  %v111_v34 = vld [vmem:[%s3343_s1 + $0xb0] sm:$0xff] }
   0x9   :  { %v1952_v31 = vpack.c.bf16 %v112_v29, %v108_v28  ;;  %v1922_v35 = vpack.c.bf16 %v109_v32, %v105_v30  ;;  %v114_v36 = vld [vmem:[%s3343_s1 + $0xc8] sm:$0xff]  ;;  %v116_v38 = vld [vmem:[%s3343_s1 + $0xd8] sm:$0xff]  ;;  %v1954_v39 = vpack.c.bf16 %v111_v34, %v107_v33  ;;  %v113_v42 = vld [vmem:[%s3343_s1 + $0xc0] sm:$0xff] }
   0xa   :  { %1919 = vmatpush1.bf16.msra.mxu0 %v1918_v22  ;;  %v118_v37 = vld [vmem:[%s3343_s1 + $0xe8] sm:$0xff]  ;;  %v120_v41 = vld [vmem:[%s3343_s1 + $0xf8] sm:$0xff]  ;;  %v117_v43 = vld [vmem:[%s3343_s1 + $0xe0] sm:$0xff] }
   0xb   :  { %1951 = vmatpush1.bf16.msra.mxu1 %v1950_v26  ;;  %1921 = vmatprep.subr.bf16.mxu0 %v1920_v27  ;;  %v1924_v40 = vpack.c.bf16 %v118_v37, %v114_v36  ;;  %v1956_v44 = vpack.c.bf16 %v120_v41, %v116_v38  ;;  %v115_v45 = vld [vmem:[%s3343_s1 + $0xd0] sm:$0xff]  ;;  %v122_v47 = vld [vmem:[%s3343_s1 + $0x108] sm:$0xff]  ;;  %v124_v49 = vld [vmem:[%s3343_s1 + $0x118] sm:$0xff]  ;;  %v1926_v51 = vpack.c.bf16 %v117_v43, %v113_v42 }
   0xc   :  { %1953 = vmatprep.subr.bf16.mxu1 %v1952_v31  ;;  %v119_v46 = vld [vmem:[%s3343_s1 + $0xf0] sm:$0xff]  ;;  %v126_v48 = vld [vmem:[%s3343_s1 + $0x128] sm:$0xff]  ;;  %v128_v50 = vld [vmem:[%s3343_s1 + $0x138] sm:$0xff] }
   0xd   :  { %v1958_v52 = vpack.c.bf16 %v119_v46, %v115_v45  ;;  %v1928_v53 = vpack.c.bf16 %v126_v48, %v122_v47  ;;  %v121_v54 = vld [vmem:[%s3343_s1 + $0x100] sm:$0xff]  ;;  %v123_v56 = vld [vmem:[%s3343_s1 + $0x110] sm:$0xff]  ;;  %v1960_v57 = vpack.c.bf16 %v128_v50, %v124_v49  ;;  %v130_v59 = vld [vmem:[%s3343_s1 + $0x148] sm:$0xff] }
   0xe   :  { %1923 = vmatpush1.bf16.msra.mxu0 %v1922_v35  ;;  %v125_v55 = vld [vmem:[%s3343_s1 + $0x120] sm:$0xff]  ;;  %v127_v58 = vld [vmem:[%s3343_s1 + $0x130] sm:$0xff]  ;;  %v134_v60 = vld [vmem:[%s3343_s1 + $0x168] sm:$0xff] }
   0xf   :  { %1955 = vmatpush1.bf16.msra.mxu1 %v1954_v39  ;;  %1925 = vmatprep.subr.bf16.mxu0 %v1924_v40  ;;  %v132_v61 = vld [vmem:[%s3343_s1 + $0x158] sm:$0xff]  ;;  %v1930_v63 = vpack.c.bf16 %v125_v55, %v121_v54  ;;  %v1962_v0 = vpack.c.bf16 %v127_v58, %v123_v56  ;;  %v1932_v1 = vpack.c.bf16 %v134_v60, %v130_v59  ;;  %v129_v2 = vld [vmem:[%s3343_s1 + $0x140] sm:$0xff]  ;;  %v131_v5 = vld [vmem:[%s3343_s1 + $0x150] sm:$0xff] }
  0x10   :  { %1957 = vmatprep.subr.bf16.mxu1 %v1956_v44  ;;  %v136_v62 = vld [vmem:[%s3343_s1 + $0x178] sm:$0xff]  ;;  %v133_v4 = vld [vmem:[%s3343_s1 + $0x160] sm:$0xff]  ;;  %v135_v7 = vld [vmem:[%s3343_s1 + $0x170] sm:$0xff] }
  0x11   :  { %v1964_v6 = vpack.c.bf16 %v136_v62, %v132_v61  ;;  %v138_v8 = vld [vmem:[%s3343_s1 + $0x188] sm:$0xff]  ;;  %v140_v10 = vld [vmem:[%s3343_s1 + $0x198] sm:$0xff]  ;;  %v1934_v12 = vpack.c.bf16 %v133_v4, %v129_v2  ;;  %v1966_v13 = vpack.c.bf16 %v135_v7, %v131_v5  ;;  %v137_v15 = vld [vmem:[%s3343_s1 + $0x180] sm:$0xff] }
  0x12   :  { %1927 = vmatpush1.bf16.msra.mxu0 %v1926_v51  ;;  %v142_v9 = vld [vmem:[%s3343_s1 + $0x1a8] sm:$0xff]  ;;  %v144_v11 = vld [vmem:[%s3343_s1 + $0x1b8] sm:$0xff]  ;;  %v141_v16 = vld [vmem:[%s3343_s1 + $0x1a0] sm:$0xff] }
  0x13   :  { %1959 = vmatpush1.bf16.msra.mxu1 %v1958_v52  ;;  %1929 = vmatprep.subr.bf16.mxu0 %v1928_v53  ;;  %v1936_v14 = vpack.c.bf16 %v142_v9, %v138_v8  ;;  %v139_v17 = vld [vmem:[%s3343_s1 + $0x190] sm:$0xff]  ;;  %v1968_v18 = vpack.c.bf16 %v144_v11, %v140_v10  ;;  %v146_v20 = vld [vmem:[%s3343_s1 + $0x1c8] sm:$0xff]  ;;  %v148_v22 = vld [vmem:[%s3343_s1 + $0x1d8] sm:$0xff]  ;;  %v1938_v24 = vpack.c.bf16 %v141_v16, %v137_v15 }
  0x14   :  { %1961 = vmatprep.subr.bf16.mxu1 %v1960_v57  ;;  %v143_v19 = vld [vmem:[%s3343_s1 + $0x1b0] sm:$0xff]  ;;  %v150_v21 = vld [vmem:[%s3343_s1 + $0x1e8] sm:$0xff]  ;;  %v152_v23 = vld [vmem:[%s3343_s1 + $0x1f8] sm:$0xff] }
  0x15   :  { %v1970_v25 = vpack.c.bf16 %v143_v19, %v139_v17  ;;  %v1940_v26 = vpack.c.bf16 %v150_v21, %v146_v20  ;;  %v145_v27 = vld [vmem:[%s3343_s1 + $0x1c0] sm:$0xff]  ;;  %v1972_v29 = vpack.c.bf16 %v152_v23, %v148_v22  ;;  %v147_v30 = vld [vmem:[%s3343_s1 + $0x1d0] sm:$0xff]  ;;  %v26_v35 = vld [vmem:[%s3344_s0 + $0x8] sm:$0xff]  ;;  %v155_v22 = vlaneseq }
  0x16   :  { %1931 = vmatpush1.bf16.msra.mxu0 %v1930_v63  ;;  %v149_v28 = vld [vmem:[%s3343_s1 + $0x1e0] sm:$0xff]  ;;  %v151_v31 = vld [vmem:[%s3343_s1 + $0x1f0] sm:$0xff]  ;;  %v28_v37 = vld [vmem:[%s3344_s0 + $0x18] sm:$0xff] }
  0x17   :  { %1963 = vmatpush1.bf16.msra.mxu1 %v1962_v0  ;;  %1933 = vmatprep.subr.bf16.mxu0 %v1932_v1  ;;  %v1942_v32 = vpack.c.bf16 %v149_v28, %v145_v27  ;;  %v1974_v33 = vpack.c.bf16 %v151_v31, %v147_v30  ;;  %v25_v34 = vld [vmem:[%s3344_s0] sm:$0xff]  ;;  %v27_v36 = vld [vmem:[%s3344_s0 + $0x10] sm:$0xff]  ;;  %v30_v39 = vld [vmem:[%s3344_s0 + $0x28] sm:$0xff] }
  0x18   :  { %1965 = vmatprep.subr.bf16.mxu1 %v1964_v6  ;;  %v29_v38 = vld [vmem:[%s3344_s0 + $0x20] sm:$0xff]  ;;  %v31_v40 = vld [vmem:[%s3344_s0 + $0x30] sm:$0xff]  ;;  %v32_v41 = vld [vmem:[%s3344_s0 + $0x38] sm:$0xff] }
  0x19   :  { %v33_v42 = vld [vmem:[%s3344_s0 + $0x40] sm:$0xff]  ;;  %v34_v43 = vld [vmem:[%s3344_s0 + $0x48] sm:$0xff]  ;;  %v35_v44 = vld [vmem:[%s3344_s0 + $0x50] sm:$0xff] }
  0x1a   :  { %1935 = vmatpush1.bf16.msra.mxu0 %v1934_v12  ;;  %v36_v45 = vld [vmem:[%s3344_s0 + $0x58] sm:$0xff]  ;;  %v37_v46 = vld [vmem:[%s3344_s0 + $0x60] sm:$0xff]  ;;  %v38_v47 = vld [vmem:[%s3344_s0 + $0x68] sm:$0xff] }
  0x1b   :  { %1967 = vmatpush1.bf16.msra.mxu1 %v1966_v13  ;;  %1937 = vmatprep.subr.bf16.mxu0 %v1936_v14  ;;  %v39_v48 = vld [vmem:[%s3344_s0 + $0x70] sm:$0xff]  ;;  %v40_v49 = vld [vmem:[%s3344_s0 + $0x78] sm:$0xff]  ;;  %v41_v50 = vld [vmem:[%s3344_s0 + $0x80] sm:$0xff] }
  0x1c   :  { %1969 = vmatprep.subr.bf16.mxu1 %v1968_v18  ;;  %v42_v51 = vld [vmem:[%s3344_s0 + $0x88] sm:$0xff]  ;;  %v43_v52 = vld [vmem:[%s3344_s0 + $0x90] sm:$0xff]  ;;  %v44_v53 = vld [vmem:[%s3344_s0 + $0x98] sm:$0xff] }
  0x1d   :  { %v45_v54 = vld [vmem:[%s3344_s0 + $0xa0] sm:$0xff]  ;;  %v46_v55 = vld [vmem:[%s3344_s0 + $0xa8] sm:$0xff]  ;;  %v47_v56 = vld [vmem:[%s3344_s0 + $0xb0] sm:$0xff] }
  0x1e   :  { %1939 = vmatpush1.bf16.msra.mxu0 %v1938_v24  ;;  %v48_v57 = vld [vmem:[%s3344_s0 + $0xb8] sm:$0xff]  ;;  %v49_v58 = vld [vmem:[%s3344_s0 + $0xc0] sm:$0xff]  ;;  %v50_v59 = vld [vmem:[%s3344_s0 + $0xc8] sm:$0xff]  ;;  %v156_v24 = vshrl.u32 %v155_v22, 7 }
  0x1f   :  { %1971 = vmatpush1.bf16.msra.mxu1 %v1970_v25  ;;  %1941 = vmatprep.subr.bf16.mxu0 %v1940_v26  ;;  %v51_v60 = vld [vmem:[%s3344_s0 + $0xd0] sm:$0xff]  ;;  %v52_v61 = vld [vmem:[%s3344_s0 + $0xd8] sm:$0xff]  ;;  %v53_v62 = vld [vmem:[%s3344_s0 + $0xe0] sm:$0xff] }
  0x20   :  { %1973 = vmatprep.subr.bf16.mxu1 %v1972_v29  ;;  %v54_v63 = vld [vmem:[%s3344_s0 + $0xe8] sm:$0xff]  ;;  %v55_v0 = vld [vmem:[%s3344_s0 + $0xf0] sm:$0xff]  ;;  %v56_v1 = vld [vmem:[%s3344_s0 + $0xf8] sm:$0xff]  ;;  %v157_v26 = vsub.s32 0, %v156_v24  ;;  %v161_v28 = vsub.s32 1, %v156_v24  ;;  %v165_v29 = vsub.s32 2, %v156_v24 }
  0x21   :  { %v57_v2 = vld [vmem:[%s3344_s0 + $0x100] sm:$0xff]  ;;  %v58_v4 = vld [vmem:[%s3344_s0 + $0x108] sm:$0xff]  ;;  %v59_v5 = vld [vmem:[%s3344_s0 + $0x110] sm:$0xff]  ;;  %v169_v30 = vsub.s32 3, %v156_v24 }
  0x22   :  { %1943 = vmatpush1.bf16.msra.mxu0 %v1942_v32  ;;  %v60_v6 = vld [vmem:[%s3344_s0 + $0x118] sm:$0xff]  ;;  %v61_v7 = vld [vmem:[%s3344_s0 + $0x120] sm:$0xff]  ;;  %v62_v8 = vld [vmem:[%s3344_s0 + $0x128] sm:$0xff] }
  0x23   :  { %1975 = vmatpush1.bf16.msra.mxu1 %v1974_v33  ;;  %v63_v9 = vld [vmem:[%s3344_s0 + $0x130] sm:$0xff]  ;;  %v64_v10 = vld [vmem:[%s3344_s0 + $0x138] sm:$0xff]  ;;  %v65_v11 = vld [vmem:[%s3344_s0 + $0x140] sm:$0xff] }
  0x24   :  { %v66_v12 = vld [vmem:[%s3344_s0 + $0x148] sm:$0xff]  ;;  %v67_v13 = vld [vmem:[%s3344_s0 + $0x150] sm:$0xff]  ;;  %v68_v14 = vld [vmem:[%s3344_s0 + $0x158] sm:$0xff] }
  0x25   :  { %240 = vmatmul.mubr.f32.vlgmr.msra.gmra.mrb[0].mxu0 %v25_v34  ;;  %v69_v15 = vld [vmem:[%s3344_s0 + $0x160] sm:$0xff]  ;;  %v70_v16 = vld [vmem:[%s3344_s0 + $0x168] sm:$0xff]  ;;  %v71_v17 = vld [vmem:[%s3344_s0 + $0x170] sm:$0xff] }
  0x26   :  { %689 = vmatmul.mubr.f32.vlgmr.msra.gmra.mrb[0].mxu1 %v25_v34  ;;  %245 = vmatprep.mubr.f32.mxu0 %v2301_v3  ;;  %v72_v18 = vld [vmem:[%s3344_s0 + $0x178] sm:$0xff]  ;;  %v73_v19 = vld [vmem:[%s3344_s0 + $0x180] sm:$0xff]  ;;  %v74_v20 = vld [vmem:[%s3344_s0 + $0x188] sm:$0xff] }
  0x27   :  { %694 = vmatprep.mubr.f32.mxu1 %v2301_v3  ;;  %v75_v21 = vld [vmem:[%s3344_s0 + $0x190] sm:$0xff]  ;;  %v76_v23 = vld [vmem:[%s3344_s0 + $0x198] sm:$0xff]  ;;  %v77_v25 = vld [vmem:[%s3344_s0 + $0x1a0] sm:$0xff] }
  0x28   :  { %v153_v27 = vld [vmem:[%s3345_s2] sm:$0xf]  ;;  %v78_v31 = vld [vmem:[%s3344_s0 + $0x1a8] sm:$0xff] }
  0x29   :  { %246 = vmatmul.mubr.f32.gmra.mrb[2].mxu0 %v26_v35  ;;  %v2806_v32 = vrot.slane %v153_v27, %v157_v26  ;;  %v2809_v34 = vrot.slane %v153_v27, %v161_v28  ;;  %v82_v22 = vld [vmem:[%s3344_s0 + $0x1c8] sm:$0xff] }
  0x2a   :  { %695 = vmatmul.mubr.f32.gmra.mrb[2].mxu1 %v26_v35  ;;  %251 = vmatprep.mubr.f32.mxu0 %v2301_v3  ;;  %v2811_v35 = vrot.slane %v153_v27, %v165_v29 }
  0x2b   :  { %700 = vmatprep.mubr.f32.mxu1 %v2301_v3 }
  0x2d   :  { %252 = vmatmul.mubr.f32.gmra.mrb[4].mxu0 %v27_v36 }
  0x2e   :  { %701 = vmatmul.mubr.f32.gmra.mrb[4].mxu1 %v27_v36  ;;  %257 = vmatprep.mubr.f32.mxu0 %v2301_v3 }
  0x2f   :  { %706 = vmatprep.mubr.f32.mxu1 %v2301_v3 }
  0x31   :  { %258 = vmatmul.mubr.f32.gmra.mrb[6].mxu0 %v28_v37 }
  0x32   :  { %707 = vmatmul.mubr.f32.gmra.mrb[6].mxu1 %v28_v37  ;;  %263 = vmatprep.mubr.f32.mxu0 %v2301_v3 }
  0x33   :  { %712 = vmatprep.mubr.f32.mxu1 %v2301_v3 }
  0x35   :  { %264 = vmatmul.mubr.f32.gmra.mrb[8].mxu0 %v29_v38 }
  0x36   :  { %713 = vmatmul.mubr.f32.gmra.mrb[8].mxu1 %v29_v38  ;;  %269 = vmatprep.mubr.f32.mxu0 %v2301_v3  ;;  %v2813_v38 = vrot.slane %v153_v27, %v169_v30 }
  0x37   :  { %718 = vmatprep.mubr.f32.mxu1 %v2301_v3 }
  0x39   :  { %270 = vmatmul.mubr.f32.gmra.mrb[10].mxu0 %v30_v39 }
  0x3a   :  { %719 = vmatmul.mubr.f32.gmra.mrb[10].mxu1 %v30_v39  ;;  %275 = vmatprep.mubr.f32.mxu0 %v2301_v3 }
  0x3b   :  { %724 = vmatprep.mubr.f32.mxu1 %v2301_v3 }
  0x3d   :  { %276 = vmatmul.mubr.f32.gmra.mrb[12].mxu0 %v31_v40 }
  0x3e   :  { %725 = vmatmul.mubr.f32.gmra.mrb[12].mxu1 %v31_v40  ;;  %281 = vmatprep.mubr.f32.mxu0 %v2301_v3  ;;  %v79_v40 = vld [vmem:[%s3344_s0 + $0x1b0] sm:$0xff] }
  0x3f   :  { %730 = vmatprep.mubr.f32.mxu1 %v2301_v3 }
  0x41   :  { %282 = vmatmul.mubr.f32.gmra.mrb[14].mxu0 %v32_v41 }
  0x42   :  { %731 = vmatmul.mubr.f32.gmra.mrb[14].mxu1 %v32_v41  ;;  %287 = vmatprep.mubr.f32.mxu0 %v2301_v3 }
  0x43   :  { %736 = vmatprep.mubr.f32.mxu1 %v2301_v3 }
  0x45   :  { %288 = vmatmul.mubr.f32.gmra.mrb[16].mxu0 %v33_v42 }
  0x46   :  { %737 = vmatmul.mubr.f32.gmra.mrb[16].mxu1 %v33_v42  ;;  %293 = vmatprep.mubr.f32.mxu0 %v2301_v3 }
  0x47   :  { %742 = vmatprep.mubr.f32.mxu1 %v2301_v3 }
  0x49   :  { %294 = vmatmul.mubr.f32.gmra.mrb[18].mxu0 %v34_v43 }
  0x4a   :  { %743 = vmatmul.mubr.f32.gmra.mrb[18].mxu1 %v34_v43  ;;  %299 = vmatprep.mubr.f32.mxu0 %v2301_v3 }
  0x4b   :  { %748 = vmatprep.mubr.f32.mxu1 %v2301_v3 }
  0x4d   :  { %300 = vmatmul.mubr.f32.gmra.mrb[20].mxu0 %v35_v44 }
  0x4e   :  { %749 = vmatmul.mubr.f32.gmra.mrb[20].mxu1 %v35_v44  ;;  %305 = vmatprep.mubr.f32.mxu0 %v2301_v3 }
  0x4f   :  { %754 = vmatprep.mubr.f32.mxu1 %v2301_v3 }
  0x51   :  { %306 = vmatmul.mubr.f32.gmra.mrb[22].mxu0 %v36_v45 }
  0x52   :  { %755 = vmatmul.mubr.f32.gmra.mrb[22].mxu1 %v36_v45  ;;  %311 = vmatprep.mubr.f32.mxu0 %v2301_v3 }
  0x53   :  { %760 = vmatprep.mubr.f32.mxu1 %v2301_v3 }
  0x55   :  { %312 = vmatmul.mubr.f32.gmra.mrb[24].mxu0 %v37_v46 }
  0x56   :  { %761 = vmatmul.mubr.f32.gmra.mrb[24].mxu1 %v37_v46  ;;  %317 = vmatprep.mubr.f32.mxu0 %v2301_v3 }
  0x57   :  { %766 = vmatprep.mubr.f32.mxu1 %v2301_v3 }
  0x59   :  { %318 = vmatmul.mubr.f32.gmra.mrb[26].mxu0 %v38_v47 }
  0x5a   :  { %767 = vmatmul.mubr.f32.gmra.mrb[26].mxu1 %v38_v47  ;;  %323 = vmatprep.mubr.f32.mxu0 %v2301_v3 }
  0x5b   :  { %772 = vmatprep.mubr.f32.mxu1 %v2301_v3 }
  0x5d   :  { %324 = vmatmul.mubr.f32.gmra.mrb[28].mxu0 %v39_v48 }
  0x5e   :  { %773 = vmatmul.mubr.f32.gmra.mrb[28].mxu1 %v39_v48  ;;  %329 = vmatprep.mubr.f32.mxu0 %v2301_v3 }
  0x5f   :  { %778 = vmatprep.mubr.f32.mxu1 %v2301_v3 }
  0x61   :  { %330 = vmatmul.mubr.f32.gmra.mrb[30].mxu0 %v40_v49 }
  0x62   :  { %779 = vmatmul.mubr.f32.gmra.mrb[30].mxu1 %v40_v49  ;;  %335 = vmatprep.mubr.f32.mxu0 %v2301_v3 }
  0x63   :  { %784 = vmatprep.mubr.f32.mxu1 %v2301_v3 }
  0x65   :  { %336 = vmatmul.mubr.f32.gmra.mrb[32].mxu0 %v41_v50 }
  0x66   :  { %785 = vmatmul.mubr.f32.gmra.mrb[32].mxu1 %v41_v50  ;;  %341 = vmatprep.mubr.f32.mxu0 %v2301_v3 }
  0x67   :  { %790 = vmatprep.mubr.f32.mxu1 %v2301_v3 }
  0x69   :  { %342 = vmatmul.mubr.f32.gmra.mrb[34].mxu0 %v42_v51 }
  0x6a   :  { %791 = vmatmul.mubr.f32.gmra.mrb[34].mxu1 %v42_v51  ;;  %347 = vmatprep.mubr.f32.mxu0 %v2301_v3 }
  0x6b   :  { %796 = vmatprep.mubr.f32.mxu1 %v2301_v3 }
  0x6d   :  { %348 = vmatmul.mubr.f32.gmra.mrb[36].mxu0 %v43_v52 }
  0x6e   :  { %797 = vmatmul.mubr.f32.gmra.mrb[36].mxu1 %v43_v52  ;;  %353 = vmatprep.mubr.f32.mxu0 %v2301_v3  ;;  %v80_v52 = vld [vmem:[%s3344_s0 + $0x1b8] sm:$0xff] }
  0x6f   :  { %802 = vmatprep.mubr.f32.mxu1 %v2301_v3 }
  0x71   :  { %354 = vmatmul.mubr.f32.gmra.mrb[38].mxu0 %v44_v53 }
  0x72   :  { %803 = vmatmul.mubr.f32.gmra.mrb[38].mxu1 %v44_v53  ;;  %359 = vmatprep.mubr.f32.mxu0 %v2301_v3 }
  0x73   :  { %808 = vmatprep.mubr.f32.mxu1 %v2301_v3 }
  0x75   :  { %360 = vmatmul.mubr.f32.gmra.mrb[40].mxu0 %v45_v54 }
  0x76   :  { %809 = vmatmul.mubr.f32.gmra.mrb[40].mxu1 %v45_v54  ;;  %365 = vmatprep.mubr.f32.mxu0 %v2301_v3 }
  0x77   :  { %814 = vmatprep.mubr.f32.mxu1 %v2301_v3 }
  0x79   :  { %366 = vmatmul.mubr.f32.gmra.mrb[42].mxu0 %v46_v55 }
  0x7a   :  { %815 = vmatmul.mubr.f32.gmra.mrb[42].mxu1 %v46_v55  ;;  %371 = vmatprep.mubr.f32.mxu0 %v2301_v3 }
  0x7b   :  { %820 = vmatprep.mubr.f32.mxu1 %v2301_v3 }
  0x7d   :  { %372 = vmatmul.mubr.f32.gmra.mrb[44].mxu0 %v47_v56 }
  0x7e   :  { %821 = vmatmul.mubr.f32.gmra.mrb[44].mxu1 %v47_v56  ;;  %377 = vmatprep.mubr.f32.mxu0 %v2301_v3 }
  0x7f   :  { %826 = vmatprep.mubr.f32.mxu1 %v2301_v3 }
  0x81   :  { %378 = vmatmul.mubr.f32.gmra.mrb[46].mxu0 %v48_v57 }
  0x82   :  { %827 = vmatmul.mubr.f32.gmra.mrb[46].mxu1 %v48_v57  ;;  %383 = vmatprep.mubr.f32.mxu0 %v2301_v3 }
  0x83   :  { %832 = vmatprep.mubr.f32.mxu1 %v2301_v3 }
  0x85   :  { %384 = vmatmul.mubr.f32.gmra.mrb[48].mxu0 %v49_v58 }
  0x86   :  { %833 = vmatmul.mubr.f32.gmra.mrb[48].mxu1 %v49_v58  ;;  %389 = vmatprep.mubr.f32.mxu0 %v2301_v3 }
  0x87   :  { %838 = vmatprep.mubr.f32.mxu1 %v2301_v3 }
  0x89   :  { %390 = vmatmul.mubr.f32.gmra.mrb[50].mxu0 %v50_v59 }
  0x8a   :  { %839 = vmatmul.mubr.f32.gmra.mrb[50].mxu1 %v50_v59  ;;  %395 = vmatprep.mubr.f32.mxu0 %v2301_v3 }
  0x8b   :  { %844 = vmatprep.mubr.f32.mxu1 %v2301_v3 }
  0x8d   :  { %396 = vmatmul.mubr.f32.gmra.mrb[52].mxu0 %v51_v60 }
  0x8e   :  { %845 = vmatmul.mubr.f32.gmra.mrb[52].mxu1 %v51_v60  ;;  %401 = vmatprep.mubr.f32.mxu0 %v2301_v3 }
  0x8f   :  { %850 = vmatprep.mubr.f32.mxu1 %v2301_v3 }
  0x91   :  { %402 = vmatmul.mubr.f32.gmra.mrb[54].mxu0 %v52_v61 }
  0x92   :  { %851 = vmatmul.mubr.f32.gmra.mrb[54].mxu1 %v52_v61  ;;  %407 = vmatprep.mubr.f32.mxu0 %v2301_v3 }
  0x93   :  { %856 = vmatprep.mubr.f32.mxu1 %v2301_v3 }
  0x95   :  { %408 = vmatmul.mubr.f32.gmra.mrb[56].mxu0 %v53_v62 }
  0x96   :  { %857 = vmatmul.mubr.f32.gmra.mrb[56].mxu1 %v53_v62  ;;  %413 = vmatprep.mubr.f32.mxu0 %v2301_v3 }
  0x97   :  { %862 = vmatprep.mubr.f32.mxu1 %v2301_v3 }
  0x99   :  { %414 = vmatmul.mubr.f32.gmra.mrb[58].mxu0 %v54_v63 }
  0x9a   :  { %863 = vmatmul.mubr.f32.gmra.mrb[58].mxu1 %v54_v63  ;;  %419 = vmatprep.mubr.f32.mxu0 %v2301_v3 }
  0x9b   :  { %868 = vmatprep.mubr.f32.mxu1 %v2301_v3 }
  0x9d   :  { %420 = vmatmul.mubr.f32.gmra.mrb[60].mxu0 %v55_v0 }
  0x9e   :  { %869 = vmatmul.mubr.f32.gmra.mrb[60].mxu1 %v55_v0  ;;  %425 = vmatprep.mubr.f32.mxu0 %v2301_v3 }
  0x9f   :  { %874 = vmatprep.mubr.f32.mxu1 %v2301_v3 }
  0xa1   :  { %426 = vmatmul.mubr.f32.gmra.mrb[62].mxu0 %v56_v1 }
  0xa2   :  { %875 = vmatmul.mubr.f32.gmra.mrb[62].mxu1 %v56_v1  ;;  %431 = vmatprep.mubr.f32.mxu0 %v2301_v3 }
  0xa3   :  { %880 = vmatprep.mubr.f32.mxu1 %v2301_v3 }
  0xa5   :  { %432 = vmatmul.mubr.f32.gmra.mrb[64].mxu0 %v57_v2 }
  0xa6   :  { %881 = vmatmul.mubr.f32.gmra.mrb[64].mxu1 %v57_v2  ;;  %437 = vmatprep.mubr.f32.mxu0 %v2301_v3 }
  0xa7   :  { %886 = vmatprep.mubr.f32.mxu1 %v2301_v3 }
  0xa9   :  { %438 = vmatmul.mubr.f32.gmra.mrb[66].mxu0 %v58_v4 }
  0xaa   :  { %887 = vmatmul.mubr.f32.gmra.mrb[66].mxu1 %v58_v4  ;;  %443 = vmatprep.mubr.f32.mxu0 %v2301_v3 }
  0xab   :  { %892 = vmatprep.mubr.f32.mxu1 %v2301_v3 }
  0xad   :  { %444 = vmatmul.mubr.f32.gmra.mrb[68].mxu0 %v59_v5 }
  0xae   :  { %893 = vmatmul.mubr.f32.gmra.mrb[68].mxu1 %v59_v5  ;;  %449 = vmatprep.mubr.f32.mxu0 %v2301_v3 }
  0xaf   :  { %898 = vmatprep.mubr.f32.mxu1 %v2301_v3 }
  0xb1   :  { %450 = vmatmul.mubr.f32.gmra.mrb[70].mxu0 %v60_v6 }
  0xb2   :  { %899 = vmatmul.mubr.f32.gmra.mrb[70].mxu1 %v60_v6  ;;  %455 = vmatprep.mubr.f32.mxu0 %v2301_v3 }
  0xb3   :  { %904 = vmatprep.mubr.f32.mxu1 %v2301_v3 }
  0xb5   :  { %456 = vmatmul.mubr.f32.gmra.mrb[72].mxu0 %v61_v7 }
  0xb6   :  { %905 = vmatmul.mubr.f32.gmra.mrb[72].mxu1 %v61_v7  ;;  %461 = vmatprep.mubr.f32.mxu0 %v2301_v3 }
  0xb7   :  { %910 = vmatprep.mubr.f32.mxu1 %v2301_v3 }
  0xb9   :  { %462 = vmatmul.mubr.f32.gmra.mrb[74].mxu0 %v62_v8 }
  0xba   :  { %911 = vmatmul.mubr.f32.gmra.mrb[74].mxu1 %v62_v8  ;;  %467 = vmatprep.mubr.f32.mxu0 %v2301_v3  ;;  %v81_v8 = vld [vmem:[%s3344_s0 + $0x1c0] sm:$0xff] }
  0xbb   :  { %916 = vmatprep.mubr.f32.mxu1 %v2301_v3 }
  0xbd   :  { %468 = vmatmul.mubr.f32.gmra.mrb[76].mxu0 %v63_v9 }
  0xbe   :  { %917 = vmatmul.mubr.f32.gmra.mrb[76].mxu1 %v63_v9  ;;  %473 = vmatprep.mubr.f32.mxu0 %v2301_v3 }
  0xbf   :  { %922 = vmatprep.mubr.f32.mxu1 %v2301_v3 }
  0xc1   :  { %474 = vmatmul.mubr.f32.gmra.mrb[78].mxu0 %v64_v10 }
  0xc2   :  { %923 = vmatmul.mubr.f32.gmra.mrb[78].mxu1 %v64_v10  ;;  %479 = vmatprep.mubr.f32.mxu0 %v2301_v3 }
  0xc3   :  { %928 = vmatprep.mubr.f32.mxu1 %v2301_v3 }
  0xc5   :  { %480 = vmatmul.mubr.f32.gmra.mrb[80].mxu0 %v65_v11 }
  0xc6   :  { %929 = vmatmul.mubr.f32.gmra.mrb[80].mxu1 %v65_v11  ;;  %485 = vmatprep.mubr.f32.mxu0 %v2301_v3 }
  0xc7   :  { %934 = vmatprep.mubr.f32.mxu1 %v2301_v3 }
  0xc9   :  { %486 = vmatmul.mubr.f32.gmra.mrb[82].mxu0 %v66_v12 }
  0xca   :  { %935 = vmatmul.mubr.f32.gmra.mrb[82].mxu1 %v66_v12  ;;  %491 = vmatprep.mubr.f32.mxu0 %v2301_v3 }
  0xcb   :  { %940 = vmatprep.mubr.f32.mxu1 %v2301_v3 }
  0xcd   :  { %492 = vmatmul.mubr.f32.gmra.mrb[84].mxu0 %v67_v13 }
  0xce   :  { %941 = vmatmul.mubr.f32.gmra.mrb[84].mxu1 %v67_v13  ;;  %497 = vmatprep.mubr.f32.mxu0 %v2301_v3 }
  0xcf   :  { %946 = vmatprep.mubr.f32.mxu1 %v2301_v3 }
  0xd1   :  { %498 = vmatmul.mubr.f32.gmra.mrb[86].mxu0 %v68_v14 }
  0xd2   :  { %947 = vmatmul.mubr.f32.gmra.mrb[86].mxu1 %v68_v14  ;;  %503 = vmatprep.mubr.f32.mxu0 %v2301_v3 }
  0xd3   :  { %952 = vmatprep.mubr.f32.mxu1 %v2301_v3 }
  0xd5   :  { %504 = vmatmul.mubr.f32.gmra.mrb[88].mxu0 %v69_v15 }
  0xd6   :  { %953 = vmatmul.mubr.f32.gmra.mrb[88].mxu1 %v69_v15  ;;  %509 = vmatprep.mubr.f32.mxu0 %v2301_v3 }
  0xd7   :  { %958 = vmatprep.mubr.f32.mxu1 %v2301_v3 }
  0xd9   :  { %510 = vmatmul.mubr.f32.gmra.mrb[90].mxu0 %v70_v16 }
  0xda   :  { %959 = vmatmul.mubr.f32.gmra.mrb[90].mxu1 %v70_v16  ;;  %515 = vmatprep.mubr.f32.mxu0 %v2301_v3 }
  0xdb   :  { %964 = vmatprep.mubr.f32.mxu1 %v2301_v3 }
  0xdd   :  { %516 = vmatmul.mubr.f32.gmra.mrb[92].mxu0 %v71_v17 }
  0xde   :  { %965 = vmatmul.mubr.f32.gmra.mrb[92].mxu1 %v71_v17  ;;  %521 = vmatprep.mubr.f32.mxu0 %v2301_v3 }
  0xdf   :  { %970 = vmatprep.mubr.f32.mxu1 %v2301_v3 }
  0xe1   :  { %522 = vmatmul.mubr.f32.gmra.mrb[94].mxu0 %v72_v18 }
  0xe2   :  { %971 = vmatmul.mubr.f32.gmra.mrb[94].mxu1 %v72_v18  ;;  %527 = vmatprep.mubr.f32.mxu0 %v2301_v3 }
  0xe3   :  { %976 = vmatprep.mubr.f32.mxu1 %v2301_v3 }
  0xe5   :  { %528 = vmatmul.mubr.f32.gmra.mrb[96].mxu0 %v73_v19 }
  0xe6   :  { %977 = vmatmul.mubr.f32.gmra.mrb[96].mxu1 %v73_v19  ;;  %533 = vmatprep.mubr.f32.mxu0 %v2301_v3 }
  0xe7   :  { %982 = vmatprep.mubr.f32.mxu1 %v2301_v3 }
  0xe9   :  { %534 = vmatmul.mubr.f32.gmra.mrb[98].mxu0 %v74_v20 }
  0xea   :  { %983 = vmatmul.mubr.f32.gmra.mrb[98].mxu1 %v74_v20  ;;  %539 = vmatprep.mubr.f32.mxu0 %v2301_v3 }
  0xeb   :  { %988 = vmatprep.mubr.f32.mxu1 %v2301_v3 }
  0xed   :  { %540 = vmatmul.mubr.f32.gmra.mrb[100].mxu0 %v75_v21 }
  0xee   :  { %989 = vmatmul.mubr.f32.gmra.mrb[100].mxu1 %v75_v21  ;;  %545 = vmatprep.mubr.f32.mxu0 %v2301_v3 }
  0xef   :  { %994 = vmatprep.mubr.f32.mxu1 %v2301_v3 }
  0xf1   :  { %546 = vmatmul.mubr.f32.gmra.mrb[102].mxu0 %v76_v23 }
  0xf2   :  { %995 = vmatmul.mubr.f32.gmra.mrb[102].mxu1 %v76_v23  ;;  %551 = vmatprep.mubr.f32.mxu0 %v2301_v3 }
  0xf3   :  { %1000 = vmatprep.mubr.f32.mxu1 %v2301_v3 }
  0xf5   :  { %552 = vmatmul.mubr.f32.gmra.mrb[104].mxu0 %v77_v25 }
  0xf6   :  { %1001 = vmatmul.mubr.f32.gmra.mrb[104].mxu1 %v77_v25  ;;  %557 = vmatprep.mubr.f32.mxu0 %v2301_v3 }
  0xf7   :  { %1006 = vmatprep.mubr.f32.mxu1 %v2301_v3 }
  0xf8   :  { %v241_v33 = vpop.f32.mrb[0].mxu0 }
  0xf9   :  { %v243_v36 = vpop.f32.mrb[1].mxu0  ;;  %v690_v37 = vpop.f32.mrb[0].mxu1  ;;  %558 = vmatmul.mubr.f32.gmra.mrb[106].mxu0 %v78_v31  ;;  %v242_v41 = vadd.f32 %v241_v33, %v2806_v32 }
  0xfa   :  { %v692_v39 = vpop.f32.mrb[1].mxu1  ;;  %1007 = vmatmul.mubr.f32.gmra.mrb[106].mxu1 %v78_v31  ;;  %563 = vmatprep.mubr.f32.mxu0 %v2301_v3  ;;  %v244_v42 = vadd.f32 %v243_v36, %v2809_v34  ;;  %v691_v43 = vadd.f32 %v690_v37, %v2811_v35 }
  0xfb   :  { %1012 = vmatprep.mubr.f32.mxu1 %v2301_v3  ;;  %v693_v45 = vadd.f32 %v692_v39, %v2813_v38  ;;  %v1073_v53 = vmax.f32 %v242_v41, 0.0  ;;  %v83_v41 = vld [vmem:[%s3344_s0 + $0x1d0] sm:$0xff] }
  0xfc   :  { %v247_v44 = vpop.f32.mrb[2].mxu0  ;;  %v1074_v56 = vmax.f32 %v244_v42, 0.0  ;;  %v1075_v57 = vmax.f32 %v691_v43, 0.0 }
  0xfd   :  { %v248_v46 = vadd.f32 %v247_v44, %v2806_v32  ;;  %v696_v47 = vpop.f32.mrb[2].mxu1  ;;  %v249_v48 = vpop.f32.mrb[3].mxu0  ;;  %564 = vmatmul.mubr.f32.gmra.mrb[108].mxu0 %v79_v40  ;;  %v1076_v61 = vmax.f32 %v693_v45, 0.0 }
  0xfe   :  { %v697_v49 = vadd.f32 %v696_v47, %v2811_v35  ;;  %v250_v50 = vadd.f32 %v249_v48, %v2809_v34  ;;  %v698_v51 = vpop.f32.mrb[3].mxu1  ;;  %1013 = vmatmul.mubr.f32.gmra.mrb[108].mxu1 %v79_v40  ;;  %569 = vmatprep.mubr.f32.mxu0 %v2301_v3 }
  0xff   :  { %v1077_v54 = vmax.f32 %v248_v46, 0.0  ;;  %v699_v55 = vadd.f32 %v698_v51, %v2813_v38  ;;  %1018 = vmatprep.mubr.f32.mxu1 %v2301_v3 }
 0x100   :  { %v1079_v58 = vmax.f32 %v697_v49, 0.0  ;;  %v1078_v59 = vmax.f32 %v250_v50, 0.0  ;;  %v253_v60 = vpop.f32.mrb[4].mxu0 }
 0x101   :  { %v1978_v62 = vpack.c.bf16 %v1077_v54, %v1073_v53  ;;  %v1080_v63 = vmax.f32 %v699_v55, 0.0  ;;  %570 = vmatmul.mubr.f32.gmra.mrb[110].mxu0 %v80_v52  ;;  %v255_v0 = vpop.f32.mrb[5].mxu0  ;;  %v702_v1 = vpop.f32.mrb[4].mxu1  ;;  %v254_v7 = vadd.f32 %v253_v60, %v2806_v32  ;;  %v84_v53 = vld [vmem:[%s3344_s0 + $0x1d8] sm:$0xff] }
 0x102   :  { %v2106_v2 = vpack.c.bf16 %v1079_v58, %v1075_v57  ;;  %v1976_v4 = vpack.c.bf16 %v1078_v59, %v1074_v56  ;;  %1019 = vmatmul.mubr.f32.gmra.mrb[110].mxu1 %v80_v52  ;;  %575 = vmatprep.mubr.f32.mxu0 %v2301_v3  ;;  %v704_v5 = vpop.f32.mrb[5].mxu1  ;;  %v256_v9 = vadd.f32 %v255_v0, %v2809_v34 }
 0x103   :  { %v2104_v6 = vpack.c.bf16 %v1080_v63, %v1076_v61  ;;  %1024 = vmatprep.mubr.f32.mxu1 %v2301_v3  ;;  %v703_v11 = vadd.f32 %v702_v1, %v2811_v35  ;;  %v705_v14 = vadd.f32 %v704_v5, %v2813_v38  ;;  %v1081_v19 = vmax.f32 %v254_v7, 0.0  ;;  %v85_v7 = vld [vmem:[%s3344_s0 + $0x1e0] sm:$0xff] }
 0x104   :  { %1977 = vmatprep.subr.bf16.mxu0 %v1976_v4  ;;  %v259_v10 = vpop.f32.mrb[6].mxu0  ;;  %v1082_v23 = vmax.f32 %v256_v9, 0.0 }
 0x105   :  { %2105 = vmatprep.subr.bf16.mxu1 %v2104_v6  ;;  %1979 = vmatpush1.bf16.msra.mxu0 %v1978_v62  ;;  %v260_v12 = vadd.f32 %v259_v10, %v2806_v32  ;;  %v261_v13 = vpop.f32.mrb[7].mxu0  ;;  %v708_v15 = vpop.f32.mrb[6].mxu1  ;;  %v1083_v24 = vmax.f32 %v703_v11, 0.0  ;;  %v1084_v29 = vmax.f32 %v705_v14, 0.0 }
 0x106   :  { %2107 = vmatpush1.bf16.msra.mxu1 %v2106_v2  ;;  %v262_v16 = vadd.f32 %v261_v13, %v2809_v34  ;;  %576 = vmatmul.mubr.f32.gmra.mrb[112].mxu0 %v81_v8  ;;  %v709_v17 = vadd.f32 %v708_v15, %v2811_v35  ;;  %v710_v18 = vpop.f32.mrb[7].mxu1 }
 0x107   :  { %v1085_v20 = vmax.f32 %v260_v12, 0.0  ;;  %v711_v21 = vadd.f32 %v710_v18, %v2813_v38  ;;  %1025 = vmatmul.mubr.f32.gmra.mrb[112].mxu1 %v81_v8  ;;  %581 = vmatprep.mubr.f32.mxu0 %v2301_v3 }
 0x108   :  { %v1086_v25 = vmax.f32 %v262_v16, 0.0  ;;  %v1087_v26 = vmax.f32 %v709_v17, 0.0  ;;  %1030 = vmatprep.mubr.f32.mxu1 %v2301_v3  ;;  %v265_v27 = vpop.f32.mrb[8].mxu0 }
 0x109   :  { %v1982_v28 = vpack.c.bf16 %v1085_v20, %v1081_v19  ;;  %v1088_v30 = vmax.f32 %v711_v21, 0.0  ;;  %v267_v31 = vpop.f32.mrb[9].mxu0  ;;  %v714_v33 = vpop.f32.mrb[8].mxu1  ;;  %v266_v42 = vadd.f32 %v265_v27, %v2806_v32  ;;  %v86_v20 = vld [vmem:[%s3344_s0 + $0x1e8] sm:$0xff] }
 0x10a   :  { %v1980_v36 = vpack.c.bf16 %v1086_v25, %v1082_v23  ;;  %v2110_v37 = vpack.c.bf16 %v1087_v26, %v1083_v24  ;;  %582 = vmatmul.mubr.f32.gmra.mrb[114].mxu0 %v82_v22  ;;  %v716_v39 = vpop.f32.mrb[9].mxu1  ;;  %v268_v43 = vadd.f32 %v267_v31, %v2809_v34  ;;  %v715_v45 = vadd.f32 %v714_v33, %v2811_v35 }
 0x10b   :  { %v2108_v40 = vpack.c.bf16 %v1088_v30, %v1084_v29  ;;  %1031 = vmatmul.mubr.f32.gmra.mrb[114].mxu1 %v82_v22  ;;  %587 = vmatprep.mubr.f32.mxu0 %v2301_v3  ;;  %v717_v48 = vadd.f32 %v716_v39, %v2813_v38  ;;  %v1089_v54 = vmax.f32 %v266_v42, 0.0 }
 0x10c   :  { %1981 = vmatprep.subr.bf16.mxu0 %v1980_v36  ;;  %1036 = vmatprep.mubr.f32.mxu1 %v2301_v3  ;;  %v271_v44 = vpop.f32.mrb[10].mxu0  ;;  %v1090_v57 = vmax.f32 %v268_v43, 0.0  ;;  %v1091_v58 = vmax.f32 %v715_v45, 0.0 }
 0x10d   :  { %1983 = vmatpush1.bf16.msra.mxu0 %v1982_v28  ;;  %2109 = vmatprep.subr.bf16.mxu1 %v2108_v40  ;;  %v272_v46 = vadd.f32 %v271_v44, %v2806_v32  ;;  %v273_v47 = vpop.f32.mrb[11].mxu0  ;;  %v720_v49 = vpop.f32.mrb[10].mxu1  ;;  %v1092_v63 = vmax.f32 %v717_v48, 0.0 }
 0x10e   :  { %588 = vmatmul.mubr.f32.gmra.mrb[116].mxu0 %v83_v41  ;;  %2111 = vmatpush1.bf16.msra.mxu1 %v2110_v37  ;;  %v274_v50 = vadd.f32 %v273_v47, %v2809_v34  ;;  %v721_v51 = vadd.f32 %v720_v49, %v2811_v35  ;;  %v722_v52 = vpop.f32.mrb[11].mxu1 }
 0x10f   :  { %1037 = vmatmul.mubr.f32.gmra.mrb[116].mxu1 %v83_v41  ;;  %593 = vmatprep.mubr.f32.mxu0 %v2301_v3  ;;  %v1093_v55 = vmax.f32 %v272_v46, 0.0  ;;  %v723_v56 = vadd.f32 %v722_v52, %v2813_v38  ;;  %v87_v41 = vld [vmem:[%s3344_s0 + $0x1f0] sm:$0xff] }
 0x110   :  { %1042 = vmatprep.mubr.f32.mxu1 %v2301_v3  ;;  %v1094_v59 = vmax.f32 %v274_v50, 0.0  ;;  %v1095_v60 = vmax.f32 %v721_v51, 0.0  ;;  %v277_v61 = vpop.f32.mrb[12].mxu0 }
 0x111   :  { %v1986_v62 = vpack.c.bf16 %v1093_v55, %v1089_v54  ;;  %v1096_v0 = vmax.f32 %v723_v56, 0.0  ;;  %v279_v1 = vpop.f32.mrb[13].mxu0  ;;  %v726_v2 = vpop.f32.mrb[12].mxu1  ;;  %v278_v9 = vadd.f32 %v277_v61, %v2806_v32  ;;  %v88_v54 = vld [vmem:[%s3344_s0 + $0x1f8] sm:$0xff] }
 0x112   :  { %594 = vmatmul.mubr.f32.gmra.mrb[118].mxu0 %v84_v53  ;;  %v1984_v4 = vpack.c.bf16 %v1094_v59, %v1090_v57  ;;  %v2114_v5 = vpack.c.bf16 %v1095_v60, %v1091_v58  ;;  %v728_v6 = vpop.f32.mrb[13].mxu1  ;;  %v280_v10 = vadd.f32 %v279_v1, %v2809_v34  ;;  %v727_v12 = vadd.f32 %v726_v2, %v2811_v35 }
 0x113   :  { %1043 = vmatmul.mubr.f32.gmra.mrb[118].mxu1 %v84_v53  ;;  %599 = vmatprep.mubr.f32.mxu0 %v2301_v3  ;;  %v2112_v8 = vpack.c.bf16 %v1096_v0, %v1092_v63  ;;  %v729_v15 = vadd.f32 %v728_v6, %v2813_v38  ;;  %v1097_v21 = vmax.f32 %v278_v9, 0.0  ;;  %v1330_v63 = vld [vmem:[%s3346_s3 + $0x8] sm:$0xff] }
 0x114   :  { %1048 = vmatprep.mubr.f32.mxu1 %v2301_v3  ;;  %1985 = vmatprep.subr.bf16.mxu0 %v1984_v4  ;;  %v283_v11 = vpop.f32.mrb[14].mxu0  ;;  %v1098_v24 = vmax.f32 %v280_v10, 0.0  ;;  %v1099_v25 = vmax.f32 %v727_v12, 0.0 }
 0x115   :  { %1987 = vmatpush1.bf16.msra.mxu0 %v1986_v62  ;;  %2113 = vmatprep.subr.bf16.mxu1 %v2112_v8  ;;  %v284_v13 = vadd.f32 %v283_v11, %v2806_v32  ;;  %v285_v14 = vpop.f32.mrb[15].mxu0  ;;  %v732_v16 = vpop.f32.mrb[14].mxu1  ;;  %v1100_v30 = vmax.f32 %v729_v15, 0.0 }
 0x116   :  { %600 = vmatmul.mubr.f32.gmra.mrb[120].mxu0 %v85_v7  ;;  %2115 = vmatpush1.bf16.msra.mxu1 %v2114_v5  ;;  %v286_v17 = vadd.f32 %v285_v14, %v2809_v34  ;;  %v733_v18 = vadd.f32 %v732_v16, %v2811_v35  ;;  %v734_v19 = vpop.f32.mrb[15].mxu1 }
 0x117   :  { %1049 = vmatmul.mubr.f32.gmra.mrb[120].mxu1 %v85_v7  ;;  %605 = vmatprep.mubr.f32.mxu0 %v2301_v3  ;;  %v1101_v22 = vmax.f32 %v284_v13, 0.0  ;;  %v735_v23 = vadd.f32 %v734_v19, %v2813_v38 }
 0x118   :  { %1054 = vmatprep.mubr.f32.mxu1 %v2301_v3  ;;  %v1102_v26 = vmax.f32 %v286_v17, 0.0  ;;  %v1103_v27 = vmax.f32 %v733_v18, 0.0  ;;  %v289_v28 = vpop.f32.mrb[16].mxu0 }
 0x119   :  { %v1990_v29 = vpack.c.bf16 %v1101_v22, %v1097_v21  ;;  %v1104_v31 = vmax.f32 %v735_v23, 0.0  ;;  %v291_v33 = vpop.f32.mrb[17].mxu0  ;;  %v738_v36 = vpop.f32.mrb[16].mxu1  ;;  %v290_v43 = vadd.f32 %v289_v28, %v2806_v32 }
 0x11a   :  { %606 = vmatmul.mubr.f32.gmra.mrb[122].mxu0 %v86_v20  ;;  %v1988_v37 = vpack.c.bf16 %v1102_v26, %v1098_v24  ;;  %v2118_v39 = vpack.c.bf16 %v1103_v27, %v1099_v25  ;;  %v740_v40 = vpop.f32.mrb[17].mxu1  ;;  %v292_v44 = vadd.f32 %v291_v33, %v2809_v34  ;;  %v739_v46 = vadd.f32 %v738_v36, %v2811_v35 }
 0x11b   :  { %1055 = vmatmul.mubr.f32.gmra.mrb[122].mxu1 %v86_v20  ;;  %611 = vmatprep.mubr.f32.mxu0 %v2301_v3  ;;  %v2116_v42 = vpack.c.bf16 %v1104_v31, %v1100_v30  ;;  %v741_v49 = vadd.f32 %v740_v40, %v2813_v38  ;;  %v1105_v55 = vmax.f32 %v290_v43, 0.0 }
 0x11c   :  { %1060 = vmatprep.mubr.f32.mxu1 %v2301_v3  ;;  %1989 = vmatprep.subr.bf16.mxu0 %v1988_v37  ;;  %v295_v45 = vpop.f32.mrb[18].mxu0  ;;  %v1106_v58 = vmax.f32 %v292_v44, 0.0  ;;  %v1107_v59 = vmax.f32 %v739_v46, 0.0 }
 0x11d   :  { %1991 = vmatpush1.bf16.msra.mxu0 %v1990_v29  ;;  %2117 = vmatprep.subr.bf16.mxu1 %v2116_v42  ;;  %v296_v47 = vadd.f32 %v295_v45, %v2806_v32  ;;  %v297_v48 = vpop.f32.mrb[19].mxu0  ;;  %v744_v50 = vpop.f32.mrb[18].mxu1  ;;  %v1108_v1 = vmax.f32 %v741_v49, 0.0 }
 0x11e   :  { %612 = vmatmul.mubr.f32.gmra.mrb[124].mxu0 %v87_v41  ;;  %2119 = vmatpush1.bf16.msra.mxu1 %v2118_v39  ;;  %v298_v51 = vadd.f32 %v297_v48, %v2809_v34  ;;  %v745_v52 = vadd.f32 %v744_v50, %v2811_v35  ;;  %v746_v53 = vpop.f32.mrb[19].mxu1 }
 0x11f   :  { %1061 = vmatmul.mubr.f32.gmra.mrb[124].mxu1 %v87_v41  ;;  %617 = vmatprep.mubr.f32.mxu0 %v2301_v3  ;;  %v1109_v56 = vmax.f32 %v296_v47, 0.0  ;;  %v747_v57 = vadd.f32 %v746_v53, %v2813_v38 }
 0x120   :  { %1066 = vmatprep.mubr.f32.mxu1 %v2301_v3  ;;  %v1110_v60 = vmax.f32 %v298_v51, 0.0  ;;  %v1111_v61 = vmax.f32 %v745_v52, 0.0  ;;  %v301_v62 = vpop.f32.mrb[20].mxu0 }
 0x121   :  { %v1994_v0 = vpack.c.bf16 %v1109_v56, %v1105_v55  ;;  %v1112_v2 = vmax.f32 %v747_v57, 0.0  ;;  %v303_v4 = vpop.f32.mrb[21].mxu0  ;;  %v750_v5 = vpop.f32.mrb[20].mxu1  ;;  %v302_v9 = vadd.f32 %v301_v62, %v2806_v32 }
 0x122   :  { %618 = vmatmul.mubr.f32.gmra.mrb[126].mxu0 %v88_v54  ;;  %v1992_v6 = vpack.c.bf16 %v1110_v60, %v1106_v58  ;;  %v2122_v7 = vpack.c.bf16 %v1111_v61, %v1107_v59  ;;  %v752_v8 = vpop.f32.mrb[21].mxu1  ;;  %v304_v10 = vadd.f32 %v303_v4, %v2809_v34  ;;  %v751_v12 = vadd.f32 %v750_v5, %v2811_v35 }
 0x123   :  { %1067 = vmatmul.mubr.f32.gmra.mrb[126].mxu1 %v88_v54  ;;  %v2120_v3 = vpack.c.bf16 %v1112_v2, %v1108_v1  ;;  %1397 = vmatprep.mubr.f32.mxu0 %v1330_v63  ;;  %v753_v15 = vadd.f32 %v752_v8, %v2813_v38  ;;  %v1113_v20 = vmax.f32 %v302_v9, 0.0 }
 0x124   :  { %1993 = vmatprep.subr.bf16.mxu0 %v1992_v6  ;;  %v307_v11 = vpop.f32.mrb[22].mxu0  ;;  %1539 = vmatprep.mubr.f32.mxu1 %v1330_v63  ;;  %v1114_v23 = vmax.f32 %v304_v10, 0.0  ;;  %v1115_v24 = vmax.f32 %v751_v12, 0.0 }
 0x125   :  { %1995 = vmatpush1.bf16.msra.mxu0 %v1994_v0  ;;  %2121 = vmatprep.subr.bf16.mxu1 %v2120_v3  ;;  %v308_v13 = vadd.f32 %v307_v11, %v2806_v32  ;;  %v309_v14 = vpop.f32.mrb[23].mxu0  ;;  %v756_v16 = vpop.f32.mrb[22].mxu1  ;;  %v1116_v29 = vmax.f32 %v753_v15, 0.0 }
 0x126   :  { %2123 = vmatpush1.bf16.msra.mxu1 %v2122_v7  ;;  %v310_v17 = vadd.f32 %v309_v14, %v2809_v34  ;;  %v757_v18 = vadd.f32 %v756_v16, %v2811_v35  ;;  %v758_v19 = vpop.f32.mrb[23].mxu1 }
 0x127   :  { %v1117_v21 = vmax.f32 %v308_v13, 0.0  ;;  %v759_v22 = vadd.f32 %v758_v19, %v2813_v38 }
 0x128   :  { %v1118_v25 = vmax.f32 %v310_v17, 0.0  ;;  %v1119_v26 = vmax.f32 %v757_v18, 0.0  ;;  %v313_v27 = vpop.f32.mrb[24].mxu0 }
 0x129   :  { %v1998_v28 = vpack.c.bf16 %v1117_v21, %v1113_v20  ;;  %v1120_v30 = vmax.f32 %v759_v22, 0.0  ;;  %v315_v31 = vpop.f32.mrb[25].mxu0  ;;  %v762_v33 = vpop.f32.mrb[24].mxu1  ;;  %v314_v41 = vadd.f32 %v313_v27, %v2806_v32 }
 0x12a   :  { %v1996_v36 = vpack.c.bf16 %v1118_v25, %v1114_v23  ;;  %v2126_v37 = vpack.c.bf16 %v1119_v26, %v1115_v24  ;;  %v764_v39 = vpop.f32.mrb[25].mxu1  ;;  %v316_v42 = vadd.f32 %v315_v31, %v2809_v34  ;;  %v763_v44 = vadd.f32 %v762_v33, %v2811_v35 }
 0x12b   :  { %v2124_v40 = vpack.c.bf16 %v1120_v30, %v1116_v29  ;;  %v765_v47 = vadd.f32 %v764_v39, %v2813_v38  ;;  %v1121_v52 = vmax.f32 %v314_v41, 0.0 }
 0x12c   :  { %1997 = vmatprep.subr.bf16.mxu0 %v1996_v36  ;;  %v319_v43 = vpop.f32.mrb[26].mxu0  ;;  %v1122_v55 = vmax.f32 %v316_v42, 0.0  ;;  %v1123_v56 = vmax.f32 %v763_v44, 0.0 }
 0x12d   :  { %1999 = vmatpush1.bf16.msra.mxu0 %v1998_v28  ;;  %2125 = vmatprep.subr.bf16.mxu1 %v2124_v40  ;;  %v320_v45 = vadd.f32 %v319_v43, %v2806_v32  ;;  %v321_v46 = vpop.f32.mrb[27].mxu0  ;;  %v768_v48 = vpop.f32.mrb[26].mxu1  ;;  %v1124_v61 = vmax.f32 %v765_v47, 0.0 }
 0x12e   :  { %2127 = vmatpush1.bf16.msra.mxu1 %v2126_v37  ;;  %v322_v49 = vadd.f32 %v321_v46, %v2809_v34  ;;  %v769_v50 = vadd.f32 %v768_v48, %v2811_v35  ;;  %v770_v51 = vpop.f32.mrb[27].mxu1 }
 0x12f   :  { %v1125_v53 = vmax.f32 %v320_v45, 0.0  ;;  %v771_v54 = vadd.f32 %v770_v51, %v2813_v38 }
 0x130   :  { %v1126_v57 = vmax.f32 %v322_v49, 0.0  ;;  %v1127_v58 = vmax.f32 %v769_v50, 0.0  ;;  %v325_v59 = vpop.f32.mrb[28].mxu0 }
 0x131   :  { %v2002_v60 = vpack.c.bf16 %v1125_v53, %v1121_v52  ;;  %v1128_v62 = vmax.f32 %v771_v54, 0.0  ;;  %v327_v63 = vpop.f32.mrb[29].mxu0  ;;  %v774_v0 = vpop.f32.mrb[28].mxu1  ;;  %v326_v6 = vadd.f32 %v325_v59, %v2806_v32 }
 0x132   :  { %v2000_v1 = vpack.c.bf16 %v1126_v57, %v1122_v55  ;;  %v2130_v2 = vpack.c.bf16 %v1127_v58, %v1123_v56  ;;  %v776_v4 = vpop.f32.mrb[29].mxu1  ;;  %v328_v7 = vadd.f32 %v327_v63, %v2809_v34  ;;  %v775_v3 = vadd.f32 %v774_v0, %v2811_v35 }
 0x133   :  { %v2128_v5 = vpack.c.bf16 %v1128_v62, %v1124_v61  ;;  %v777_v11 = vadd.f32 %v776_v4, %v2813_v38  ;;  %v1129_v16 = vmax.f32 %v326_v6, 0.0 }
 0x134   :  { %2001 = vmatprep.subr.bf16.mxu0 %v2000_v1  ;;  %v331_v8 = vpop.f32.mrb[30].mxu0  ;;  %v1130_v19 = vmax.f32 %v328_v7, 0.0  ;;  %v1131_v20 = vmax.f32 %v775_v3, 0.0 }
 0x135   :  { %2003 = vmatpush1.bf16.msra.mxu0 %v2002_v60  ;;  %2129 = vmatprep.subr.bf16.mxu1 %v2128_v5  ;;  %v332_v9 = vadd.f32 %v331_v8, %v2806_v32  ;;  %v333_v10 = vpop.f32.mrb[31].mxu0  ;;  %v780_v12 = vpop.f32.mrb[30].mxu1  ;;  %v1132_v25 = vmax.f32 %v777_v11, 0.0 }
 0x136   :  { %2131 = vmatpush1.bf16.msra.mxu1 %v2130_v2  ;;  %v334_v13 = vadd.f32 %v333_v10, %v2809_v34  ;;  %v781_v14 = vadd.f32 %v780_v12, %v2811_v35  ;;  %v782_v15 = vpop.f32.mrb[31].mxu1 }
 0x137   :  { %v1133_v17 = vmax.f32 %v332_v9, 0.0  ;;  %v783_v18 = vadd.f32 %v782_v15, %v2813_v38 }
 0x138   :  { %v1134_v21 = vmax.f32 %v334_v13, 0.0  ;;  %v1135_v22 = vmax.f32 %v781_v14, 0.0  ;;  %v337_v23 = vpop.f32.mrb[32].mxu0 }
 0x139   :  { %v2006_v24 = vpack.c.bf16 %v1133_v17, %v1129_v16  ;;  %v1136_v26 = vmax.f32 %v783_v18, 0.0  ;;  %v339_v27 = vpop.f32.mrb[33].mxu0  ;;  %v786_v28 = vpop.f32.mrb[32].mxu1  ;;  %v338_v36 = vadd.f32 %v337_v23, %v2806_v32 }
 0x13a   :  { %v2004_v29 = vpack.c.bf16 %v1134_v21, %v1130_v19  ;;  %v2134_v30 = vpack.c.bf16 %v1135_v22, %v1131_v20  ;;  %v788_v31 = vpop.f32.mrb[33].mxu1  ;;  %v340_v37 = vadd.f32 %v339_v27, %v2809_v34  ;;  %v787_v40 = vadd.f32 %v786_v28, %v2811_v35 }
 0x13b   :  { %v2132_v33 = vpack.c.bf16 %v1136_v26, %v1132_v25  ;;  %v789_v43 = vadd.f32 %v788_v31, %v2813_v38  ;;  %v1137_v48 = vmax.f32 %v338_v36, 0.0 }
 0x13c   :  { %2005 = vmatprep.subr.bf16.mxu0 %v2004_v29  ;;  %v343_v39 = vpop.f32.mrb[34].mxu0  ;;  %v1138_v51 = vmax.f32 %v340_v37, 0.0  ;;  %v1139_v52 = vmax.f32 %v787_v40, 0.0 }
 0x13d   :  { %2007 = vmatpush1.bf16.msra.mxu0 %v2006_v24  ;;  %2133 = vmatprep.subr.bf16.mxu1 %v2132_v33  ;;  %v344_v41 = vadd.f32 %v343_v39, %v2806_v32  ;;  %v345_v42 = vpop.f32.mrb[35].mxu0  ;;  %v792_v44 = vpop.f32.mrb[34].mxu1  ;;  %v1140_v57 = vmax.f32 %v789_v43, 0.0 }
 0x13e   :  { %2135 = vmatpush1.bf16.msra.mxu1 %v2134_v30  ;;  %v346_v45 = vadd.f32 %v345_v42, %v2809_v34  ;;  %v793_v46 = vadd.f32 %v792_v44, %v2811_v35  ;;  %v794_v47 = vpop.f32.mrb[35].mxu1 }
 0x13f   :  { %v1141_v49 = vmax.f32 %v344_v41, 0.0  ;;  %v795_v50 = vadd.f32 %v794_v47, %v2813_v38 }
 0x140   :  { %v1142_v53 = vmax.f32 %v346_v45, 0.0  ;;  %v1143_v54 = vmax.f32 %v793_v46, 0.0  ;;  %v349_v55 = vpop.f32.mrb[36].mxu0 }
 0x141   :  { %v2010_v56 = vpack.c.bf16 %v1141_v49, %v1137_v48  ;;  %v1144_v58 = vmax.f32 %v795_v50, 0.0  ;;  %v351_v59 = vpop.f32.mrb[37].mxu0  ;;  %v798_v60 = vpop.f32.mrb[36].mxu1  ;;  %v350_v1 = vadd.f32 %v349_v55, %v2806_v32 }
 0x142   :  { %v2008_v61 = vpack.c.bf16 %v1142_v53, %v1138_v51  ;;  %v2138_v62 = vpack.c.bf16 %v1143_v54, %v1139_v52  ;;  %v800_v63 = vpop.f32.mrb[37].mxu1  ;;  %v352_v2 = vadd.f32 %v351_v59, %v2809_v34  ;;  %v799_v5 = vadd.f32 %v798_v60, %v2811_v35 }
 0x143   :  { %v2136_v0 = vpack.c.bf16 %v1144_v58, %v1140_v57  ;;  %v801_v8 = vadd.f32 %v800_v63, %v2813_v38  ;;  %v1145_v12 = vmax.f32 %v350_v1, 0.0 }
 0x144   :  { %2009 = vmatprep.subr.bf16.mxu0 %v2008_v61  ;;  %v355_v4 = vpop.f32.mrb[38].mxu0  ;;  %v1146_v15 = vmax.f32 %v352_v2, 0.0  ;;  %v1147_v16 = vmax.f32 %v799_v5, 0.0 }
 0x145   :  { %2011 = vmatpush1.bf16.msra.mxu0 %v2010_v56  ;;  %2137 = vmatprep.subr.bf16.mxu1 %v2136_v0  ;;  %v356_v6 = vadd.f32 %v355_v4, %v2806_v32  ;;  %v357_v7 = vpop.f32.mrb[39].mxu0  ;;  %v804_v3 = vpop.f32.mrb[38].mxu1  ;;  %v1148_v21 = vmax.f32 %v801_v8, 0.0 }
 0x146   :  { %2139 = vmatpush1.bf16.msra.mxu1 %v2138_v62  ;;  %v358_v9 = vadd.f32 %v357_v7, %v2809_v34  ;;  %v805_v10 = vadd.f32 %v804_v3, %v2811_v35  ;;  %v806_v11 = vpop.f32.mrb[39].mxu1 }
 0x147   :  { %v1149_v13 = vmax.f32 %v356_v6, 0.0  ;;  %v807_v14 = vadd.f32 %v806_v11, %v2813_v38 }
 0x148   :  { %v1150_v17 = vmax.f32 %v358_v9, 0.0  ;;  %v1151_v18 = vmax.f32 %v805_v10, 0.0  ;;  %v361_v19 = vpop.f32.mrb[40].mxu0 }
 0x149   :  { %v2014_v20 = vpack.c.bf16 %v1149_v13, %v1145_v12  ;;  %v1152_v22 = vmax.f32 %v807_v14, 0.0  ;;  %v363_v23 = vpop.f32.mrb[41].mxu0  ;;  %v810_v24 = vpop.f32.mrb[40].mxu1  ;;  %v362_v29 = vadd.f32 %v361_v19, %v2806_v32 }
 0x14a   :  { %v2012_v25 = vpack.c.bf16 %v1150_v17, %v1146_v15  ;;  %v2142_v26 = vpack.c.bf16 %v1151_v18, %v1147_v16  ;;  %v812_v27 = vpop.f32.mrb[41].mxu1  ;;  %v364_v30 = vadd.f32 %v363_v23, %v2809_v34  ;;  %v811_v33 = vadd.f32 %v810_v24, %v2811_v35 }
 0x14b   :  { %v2140_v28 = vpack.c.bf16 %v1152_v22, %v1148_v21  ;;  %v813_v39 = vadd.f32 %v812_v27, %v2813_v38  ;;  %v1153_v44 = vmax.f32 %v362_v29, 0.0 }
 0x14c   :  { %v367_v31 = vpop.f32.mrb[42].mxu0  ;;  %2013 = vmatprep.subr.bf16.mxu0 %v2012_v25  ;;  %v1154_v47 = vmax.f32 %v364_v30, 0.0  ;;  %v1155_v48 = vmax.f32 %v811_v33, 0.0 }
 0x14d   :  { %v368_v36 = vadd.f32 %v367_v31, %v2806_v32  ;;  %v369_v37 = vpop.f32.mrb[43].mxu0  ;;  %2015 = vmatpush1.bf16.msra.mxu0 %v2014_v20  ;;  %v816_v40 = vpop.f32.mrb[42].mxu1  ;;  %2141 = vmatprep.subr.bf16.mxu1 %v2140_v28  ;;  %v1156_v53 = vmax.f32 %v813_v39, 0.0 }
 0x14e   :  { %v370_v41 = vadd.f32 %v369_v37, %v2809_v34  ;;  %v817_v42 = vadd.f32 %v816_v40, %v2811_v35  ;;  %v818_v43 = vpop.f32.mrb[43].mxu1  ;;  %2143 = vmatpush1.bf16.msra.mxu1 %v2142_v26 }
 0x14f   :  { %v1157_v45 = vmax.f32 %v368_v36, 0.0  ;;  %v819_v46 = vadd.f32 %v818_v43, %v2813_v38 }
 0x150   :  { %v1158_v49 = vmax.f32 %v370_v41, 0.0  ;;  %v1159_v50 = vmax.f32 %v817_v42, 0.0  ;;  %v373_v51 = vpop.f32.mrb[44].mxu0 }
 0x151   :  { %v2018_v52 = vpack.c.bf16 %v1157_v45, %v1153_v44  ;;  %v1160_v54 = vmax.f32 %v819_v46, 0.0  ;;  %v375_v55 = vpop.f32.mrb[45].mxu0  ;;  %v822_v56 = vpop.f32.mrb[44].mxu1  ;;  %v374_v61 = vadd.f32 %v373_v51, %v2806_v32 }
 0x152   :  { %v2016_v57 = vpack.c.bf16 %v1158_v49, %v1154_v47  ;;  %v2146_v58 = vpack.c.bf16 %v1159_v50, %v1155_v48  ;;  %v824_v59 = vpop.f32.mrb[45].mxu1  ;;  %v376_v62 = vadd.f32 %v375_v55, %v2809_v34  ;;  %v823_v0 = vadd.f32 %v822_v56, %v2811_v35 }
 0x153   :  { %v2144_v60 = vpack.c.bf16 %v1160_v54, %v1156_v53  ;;  %v825_v4 = vadd.f32 %v824_v59, %v2813_v38  ;;  %v1161_v3 = vmax.f32 %v374_v61, 0.0 }
 0x154   :  { %v379_v63 = vpop.f32.mrb[46].mxu0  ;;  %2017 = vmatprep.subr.bf16.mxu0 %v2016_v57  ;;  %v1162_v11 = vmax.f32 %v376_v62, 0.0  ;;  %v1163_v12 = vmax.f32 %v823_v0, 0.0 }
 0x155   :  { %v380_v1 = vadd.f32 %v379_v63, %v2806_v32  ;;  %v381_v2 = vpop.f32.mrb[47].mxu0  ;;  %2019 = vmatpush1.bf16.msra.mxu0 %v2018_v52  ;;  %v828_v5 = vpop.f32.mrb[46].mxu1  ;;  %2145 = vmatprep.subr.bf16.mxu1 %v2144_v60  ;;  %v1164_v17 = vmax.f32 %v825_v4, 0.0 }
 0x156   :  { %v382_v6 = vadd.f32 %v381_v2, %v2809_v34  ;;  %v829_v7 = vadd.f32 %v828_v5, %v2811_v35  ;;  %v830_v8 = vpop.f32.mrb[47].mxu1  ;;  %2147 = vmatpush1.bf16.msra.mxu1 %v2146_v58 }
 0x157   :  { %v1165_v9 = vmax.f32 %v380_v1, 0.0  ;;  %v831_v10 = vadd.f32 %v830_v8, %v2813_v38 }
 0x158   :  { %v1166_v13 = vmax.f32 %v382_v6, 0.0  ;;  %v1167_v14 = vmax.f32 %v829_v7, 0.0  ;;  %v385_v15 = vpop.f32.mrb[48].mxu0 }
 0x159   :  { %v2022_v16 = vpack.c.bf16 %v1165_v9, %v1161_v3  ;;  %v1168_v18 = vmax.f32 %v831_v10, 0.0  ;;  %v387_v19 = vpop.f32.mrb[49].mxu0  ;;  %v834_v20 = vpop.f32.mrb[48].mxu1  ;;  %v386_v25 = vadd.f32 %v385_v15, %v2806_v32 }
 0x15a   :  { %v2020_v21 = vpack.c.bf16 %v1166_v13, %v1162_v11  ;;  %v2150_v22 = vpack.c.bf16 %v1167_v14, %v1163_v12  ;;  %v836_v23 = vpop.f32.mrb[49].mxu1  ;;  %v388_v26 = vadd.f32 %v387_v19, %v2809_v34  ;;  %v835_v28 = vadd.f32 %v834_v20, %v2811_v35 }
 0x15b   :  { %v2148_v24 = vpack.c.bf16 %v1168_v18, %v1164_v17  ;;  %v837_v31 = vadd.f32 %v836_v23, %v2813_v38  ;;  %v1169_v40 = vmax.f32 %v386_v25, 0.0 }
 0x15c   :  { %v391_v27 = vpop.f32.mrb[50].mxu0  ;;  %2021 = vmatprep.subr.bf16.mxu0 %v2020_v21  ;;  %v1170_v43 = vmax.f32 %v388_v26, 0.0  ;;  %v1171_v44 = vmax.f32 %v835_v28, 0.0 }
 0x15d   :  { %v392_v29 = vadd.f32 %v391_v27, %v2806_v32  ;;  %v393_v30 = vpop.f32.mrb[51].mxu0  ;;  %2023 = vmatpush1.bf16.msra.mxu0 %v2022_v16  ;;  %v840_v33 = vpop.f32.mrb[50].mxu1  ;;  %2149 = vmatprep.subr.bf16.mxu1 %v2148_v24  ;;  %v1172_v49 = vmax.f32 %v837_v31, 0.0 }
 0x15e   :  { %v394_v36 = vadd.f32 %v393_v30, %v2809_v34  ;;  %v841_v37 = vadd.f32 %v840_v33, %v2811_v35  ;;  %v842_v39 = vpop.f32.mrb[51].mxu1  ;;  %2151 = vmatpush1.bf16.msra.mxu1 %v2150_v22 }
 0x15f   :  { %v1173_v41 = vmax.f32 %v392_v29, 0.0  ;;  %v843_v42 = vadd.f32 %v842_v39, %v2813_v38 }
 0x160   :  { %v1174_v45 = vmax.f32 %v394_v36, 0.0  ;;  %v1175_v46 = vmax.f32 %v841_v37, 0.0  ;;  %v397_v47 = vpop.f32.mrb[52].mxu0 }
 0x161   :  { %v2026_v48 = vpack.c.bf16 %v1173_v41, %v1169_v40  ;;  %v1176_v50 = vmax.f32 %v843_v42, 0.0  ;;  %v399_v51 = vpop.f32.mrb[53].mxu0  ;;  %v846_v52 = vpop.f32.mrb[52].mxu1  ;;  %v398_v57 = vadd.f32 %v397_v47, %v2806_v32 }
 0x162   :  { %v2024_v53 = vpack.c.bf16 %v1174_v45, %v1170_v43  ;;  %v2154_v54 = vpack.c.bf16 %v1175_v46, %v1171_v44  ;;  %v848_v55 = vpop.f32.mrb[53].mxu1  ;;  %v400_v58 = vadd.f32 %v399_v51, %v2809_v34  ;;  %v847_v60 = vadd.f32 %v846_v52, %v2811_v35 }
 0x163   :  { %v2152_v56 = vpack.c.bf16 %v1176_v50, %v1172_v49  ;;  %v849_v63 = vadd.f32 %v848_v55, %v2813_v38  ;;  %v1177_v5 = vmax.f32 %v398_v57, 0.0 }
 0x164   :  { %v403_v59 = vpop.f32.mrb[54].mxu0  ;;  %2025 = vmatprep.subr.bf16.mxu0 %v2024_v53  ;;  %v1178_v8 = vmax.f32 %v400_v58, 0.0  ;;  %v1179_v3 = vmax.f32 %v847_v60, 0.0 }
 0x165   :  { %v404_v61 = vadd.f32 %v403_v59, %v2806_v32  ;;  %v405_v62 = vpop.f32.mrb[55].mxu0  ;;  %2027 = vmatpush1.bf16.msra.mxu0 %v2026_v48  ;;  %v852_v0 = vpop.f32.mrb[54].mxu1  ;;  %2153 = vmatprep.subr.bf16.mxu1 %v2152_v56  ;;  %v1180_v13 = vmax.f32 %v849_v63, 0.0 }
 0x166   :  { %v406_v1 = vadd.f32 %v405_v62, %v2809_v34  ;;  %v853_v2 = vadd.f32 %v852_v0, %v2811_v35  ;;  %v854_v4 = vpop.f32.mrb[55].mxu1  ;;  %2155 = vmatpush1.bf16.msra.mxu1 %v2154_v54 }
 0x167   :  { %v1181_v6 = vmax.f32 %v404_v61, 0.0  ;;  %v855_v7 = vadd.f32 %v854_v4, %v2813_v38 }
 0x168   :  { %v1182_v9 = vmax.f32 %v406_v1, 0.0  ;;  %v1183_v10 = vmax.f32 %v853_v2, 0.0  ;;  %v409_v11 = vpop.f32.mrb[56].mxu0 }
 0x169   :  { %v2030_v12 = vpack.c.bf16 %v1181_v6, %v1177_v5  ;;  %v1184_v14 = vmax.f32 %v855_v7, 0.0  ;;  %v411_v15 = vpop.f32.mrb[57].mxu0  ;;  %v858_v16 = vpop.f32.mrb[56].mxu1  ;;  %v410_v21 = vadd.f32 %v409_v11, %v2806_v32 }
 0x16a   :  { %v2028_v17 = vpack.c.bf16 %v1182_v9, %v1178_v8  ;;  %v2158_v18 = vpack.c.bf16 %v1183_v10, %v1179_v3  ;;  %v860_v19 = vpop.f32.mrb[57].mxu1  ;;  %v412_v22 = vadd.f32 %v411_v15, %v2809_v34  ;;  %v859_v24 = vadd.f32 %v858_v16, %v2811_v35 }
 0x16b   :  { %v2156_v20 = vpack.c.bf16 %v1184_v14, %v1180_v13  ;;  %v861_v27 = vadd.f32 %v860_v19, %v2813_v38  ;;  %v1185_v33 = vmax.f32 %v410_v21, 0.0 }
 0x16c   :  { %v415_v23 = vpop.f32.mrb[58].mxu0  ;;  %2029 = vmatprep.subr.bf16.mxu0 %v2028_v17  ;;  %v1186_v39 = vmax.f32 %v412_v22, 0.0  ;;  %v1187_v40 = vmax.f32 %v859_v24, 0.0 }
 0x16d   :  { %v416_v25 = vadd.f32 %v415_v23, %v2806_v32  ;;  %v417_v26 = vpop.f32.mrb[59].mxu0  ;;  %2031 = vmatpush1.bf16.msra.mxu0 %v2030_v12  ;;  %v864_v28 = vpop.f32.mrb[58].mxu1  ;;  %2157 = vmatprep.subr.bf16.mxu1 %v2156_v20  ;;  %v1188_v45 = vmax.f32 %v861_v27, 0.0 }
 0x16e   :  { %v418_v29 = vadd.f32 %v417_v26, %v2809_v34  ;;  %v865_v30 = vadd.f32 %v864_v28, %v2811_v35  ;;  %v866_v31 = vpop.f32.mrb[59].mxu1  ;;  %2159 = vmatpush1.bf16.msra.mxu1 %v2158_v18 }
 0x16f   :  { %v1189_v36 = vmax.f32 %v416_v25, 0.0  ;;  %v867_v37 = vadd.f32 %v866_v31, %v2813_v38  ;;  %v1329_v25 = vld [vmem:[%s3346_s3] sm:$0xff] }
 0x170   :  { %v1190_v41 = vmax.f32 %v418_v29, 0.0  ;;  %v1191_v42 = vmax.f32 %v865_v30, 0.0  ;;  %v421_v43 = vpop.f32.mrb[60].mxu0  ;;  %v1332_v29 = vld [vmem:[%s3346_s3 + $0x18] sm:$0xff] }
 0x171   :  { %v2034_v44 = vpack.c.bf16 %v1189_v36, %v1185_v33  ;;  %v1192_v46 = vmax.f32 %v867_v37, 0.0  ;;  %v423_v47 = vpop.f32.mrb[61].mxu0  ;;  %v870_v48 = vpop.f32.mrb[60].mxu1  ;;  %v422_v53 = vadd.f32 %v421_v43, %v2806_v32 }
 0x172   :  { %v2032_v49 = vpack.c.bf16 %v1190_v41, %v1186_v39  ;;  %v2162_v50 = vpack.c.bf16 %v1191_v42, %v1187_v40  ;;  %v872_v51 = vpop.f32.mrb[61].mxu1  ;;  %v424_v54 = vadd.f32 %v423_v47, %v2809_v34  ;;  %v871_v56 = vadd.f32 %v870_v48, %v2811_v35 }
 0x173   :  { %v2160_v52 = vpack.c.bf16 %v1192_v46, %v1188_v45  ;;  %v873_v59 = vadd.f32 %v872_v51, %v2813_v38  ;;  %v1193_v0 = vmax.f32 %v422_v53, 0.0 }
 0x174   :  { %v427_v55 = vpop.f32.mrb[62].mxu0  ;;  %2033 = vmatprep.subr.bf16.mxu0 %v2032_v49  ;;  %v1194_v4 = vmax.f32 %v424_v54, 0.0  ;;  %v1195_v5 = vmax.f32 %v871_v56, 0.0 }
 0x175   :  { %v428_v57 = vadd.f32 %v427_v55, %v2806_v32  ;;  %v429_v58 = vpop.f32.mrb[63].mxu0  ;;  %2035 = vmatpush1.bf16.msra.mxu0 %v2034_v44  ;;  %v876_v60 = vpop.f32.mrb[62].mxu1  ;;  %2161 = vmatprep.subr.bf16.mxu1 %v2160_v52  ;;  %v1196_v9 = vmax.f32 %v873_v59, 0.0 }
 0x176   :  { %v430_v61 = vadd.f32 %v429_v58, %v2809_v34  ;;  %v877_v62 = vadd.f32 %v876_v60, %v2811_v35  ;;  %v878_v63 = vpop.f32.mrb[63].mxu1  ;;  %2163 = vmatpush1.bf16.msra.mxu1 %v2162_v50 }
 0x177   :  { %v1197_v1 = vmax.f32 %v428_v57, 0.0  ;;  %v879_v2 = vadd.f32 %v878_v63, %v2813_v38 }
 0x178   :  { %v1198_v6 = vmax.f32 %v430_v61, 0.0  ;;  %v1199_v7 = vmax.f32 %v877_v62, 0.0  ;;  %v433_v8 = vpop.f32.mrb[64].mxu0 }
 0x179   :  { %v2038_v3 = vpack.c.bf16 %v1197_v1, %v1193_v0  ;;  %v1200_v10 = vmax.f32 %v879_v2, 0.0  ;;  %v435_v11 = vpop.f32.mrb[65].mxu0  ;;  %v882_v12 = vpop.f32.mrb[64].mxu1  ;;  %v434_v17 = vadd.f32 %v433_v8, %v2806_v32 }
 0x17a   :  { %v2036_v13 = vpack.c.bf16 %v1198_v6, %v1194_v4  ;;  %v2166_v14 = vpack.c.bf16 %v1199_v7, %v1195_v5  ;;  %v884_v15 = vpop.f32.mrb[65].mxu1  ;;  %v436_v18 = vadd.f32 %v435_v11, %v2809_v34  ;;  %v883_v20 = vadd.f32 %v882_v12, %v2811_v35 }
 0x17b   :  { %v2164_v16 = vpack.c.bf16 %v1200_v10, %v1196_v9  ;;  %v885_v23 = vadd.f32 %v884_v15, %v2813_v38  ;;  %v1201_v30 = vmax.f32 %v434_v17, 0.0 }
 0x17c   :  { %v439_v19 = vpop.f32.mrb[66].mxu0  ;;  %2037 = vmatprep.subr.bf16.mxu0 %v2036_v13  ;;  %v1202_v36 = vmax.f32 %v436_v18, 0.0  ;;  %v1203_v37 = vmax.f32 %v883_v20, 0.0 }
 0x17d   :  { %v440_v21 = vadd.f32 %v439_v19, %v2806_v32  ;;  %v441_v22 = vpop.f32.mrb[67].mxu0  ;;  %2039 = vmatpush1.bf16.msra.mxu0 %v2038_v3  ;;  %v888_v24 = vpop.f32.mrb[66].mxu1  ;;  %2165 = vmatprep.subr.bf16.mxu1 %v2164_v16  ;;  %v1204_v43 = vmax.f32 %v885_v23, 0.0 }
 0x17e   :  { %v442_v26 = vadd.f32 %v441_v22, %v2809_v34  ;;  %v889_v27 = vadd.f32 %v888_v24, %v2811_v35  ;;  %v890_v28 = vpop.f32.mrb[67].mxu1  ;;  %2167 = vmatpush1.bf16.msra.mxu1 %v2166_v14 }
 0x17f   :  { %v1205_v31 = vmax.f32 %v440_v21, 0.0  ;;  %v891_v33 = vadd.f32 %v890_v28, %v2813_v38 }
 0x180   :  { %v1206_v39 = vmax.f32 %v442_v26, 0.0  ;;  %v445_v40 = vpop.f32.mrb[68].mxu0  ;;  %v1207_v41 = vmax.f32 %v889_v27, 0.0  ;;  %1398 = vmatmul.mubr.f32.vlgmr.msra.gmra.mrb[128].mxu0 %v1329_v25 }
 0x181   :  { %v2042_v42 = vpack.c.bf16 %v1205_v31, %v1201_v30  ;;  %v447_v44 = vpop.f32.mrb[69].mxu0  ;;  %v1208_v45 = vmax.f32 %v891_v33, 0.0  ;;  %v894_v46 = vpop.f32.mrb[68].mxu1  ;;  %1540 = vmatmul.mubr.f32.vlgmr.msra.gmra.mrb[128].mxu1 %v1329_v25  ;;  %1468 = vmatprep.mubr.f32.mxu0 %v1332_v29  ;;  %v446_v50 = vadd.f32 %v445_v40, %v2806_v32 }
 0x182   :  { %v2040_v47 = vpack.c.bf16 %v1206_v39, %v1202_v36  ;;  %v2170_v48 = vpack.c.bf16 %v1207_v41, %v1203_v37  ;;  %v896_v49 = vpop.f32.mrb[69].mxu1  ;;  %1610 = vmatprep.mubr.f32.mxu1 %v1332_v29  ;;  %v448_v52 = vadd.f32 %v447_v44, %v2809_v34  ;;  %v895_v54 = vadd.f32 %v894_v46, %v2811_v35 }
 0x183   :  { %v2168_v51 = vpack.c.bf16 %v1208_v45, %v1204_v43  ;;  %v897_v57 = vadd.f32 %v896_v49, %v2813_v38  ;;  %v1209_v62 = vmax.f32 %v446_v50, 0.0 }
 0x184   :  { %v451_v53 = vpop.f32.mrb[70].mxu0  ;;  %2041 = vmatprep.subr.bf16.mxu0 %v2040_v47  ;;  %v1210_v1 = vmax.f32 %v448_v52, 0.0  ;;  %v1211_v2 = vmax.f32 %v895_v54, 0.0 }
 0x185   :  { %v452_v55 = vadd.f32 %v451_v53, %v2806_v32  ;;  %v453_v56 = vpop.f32.mrb[71].mxu0  ;;  %v900_v58 = vpop.f32.mrb[70].mxu1  ;;  %2043 = vmatpush1.bf16.msra.mxu0 %v2042_v42  ;;  %2169 = vmatprep.subr.bf16.mxu1 %v2168_v51  ;;  %v1212_v8 = vmax.f32 %v897_v57, 0.0 }
 0x186   :  { %v454_v59 = vadd.f32 %v453_v56, %v2809_v34  ;;  %v901_v60 = vadd.f32 %v900_v58, %v2811_v35  ;;  %v902_v61 = vpop.f32.mrb[71].mxu1  ;;  %2171 = vmatpush1.bf16.msra.mxu1 %v2170_v48 }
 0x187   :  { %v1213_v63 = vmax.f32 %v452_v55, 0.0  ;;  %v903_v0 = vadd.f32 %v902_v61, %v2813_v38 }
 0x188   :  { %v1214_v4 = vmax.f32 %v454_v59, 0.0  ;;  %v457_v5 = vpop.f32.mrb[72].mxu0  ;;  %v1215_v6 = vmax.f32 %v901_v60, 0.0 }
 0x189   :  { %v2046_v7 = vpack.c.bf16 %v1213_v63, %v1209_v62  ;;  %v459_v3 = vpop.f32.mrb[73].mxu0  ;;  %v1216_v9 = vmax.f32 %v903_v0, 0.0  ;;  %v906_v10 = vpop.f32.mrb[72].mxu1  ;;  %v458_v14 = vadd.f32 %v457_v5, %v2806_v32 }
 0x18a   :  { %v2044_v11 = vpack.c.bf16 %v1214_v4, %v1210_v1  ;;  %v2174_v12 = vpack.c.bf16 %v1215_v6, %v1211_v2  ;;  %v908_v13 = vpop.f32.mrb[73].mxu1  ;;  %v460_v16 = vadd.f32 %v459_v3, %v2809_v34  ;;  %v907_v18 = vadd.f32 %v906_v10, %v2811_v35 }
 0x18b   :  { %v2172_v15 = vpack.c.bf16 %v1216_v9, %v1212_v8  ;;  %v909_v21 = vadd.f32 %v908_v13, %v2813_v38  ;;  %v1217_v26 = vmax.f32 %v458_v14, 0.0 }
 0x18c   :  { %v463_v17 = vpop.f32.mrb[74].mxu0  ;;  %2045 = vmatprep.subr.bf16.mxu0 %v2044_v11  ;;  %v1218_v29 = vmax.f32 %v460_v16, 0.0  ;;  %v1219_v30 = vmax.f32 %v907_v18, 0.0 }
 0x18d   :  { %v464_v19 = vadd.f32 %v463_v17, %v2806_v32  ;;  %v465_v20 = vpop.f32.mrb[75].mxu0  ;;  %v912_v22 = vpop.f32.mrb[74].mxu1  ;;  %2047 = vmatpush1.bf16.msra.mxu0 %v2046_v7  ;;  %2173 = vmatprep.subr.bf16.mxu1 %v2172_v15  ;;  %v1220_v39 = vmax.f32 %v909_v21, 0.0 }
 0x18e   :  { %v466_v23 = vadd.f32 %v465_v20, %v2809_v34  ;;  %v913_v24 = vadd.f32 %v912_v22, %v2811_v35  ;;  %v914_v25 = vpop.f32.mrb[75].mxu1  ;;  %2175 = vmatpush1.bf16.msra.mxu1 %v2174_v12 }
 0x18f   :  { %v1221_v27 = vmax.f32 %v464_v19, 0.0  ;;  %v915_v28 = vadd.f32 %v914_v25, %v2813_v38 }
 0x190   :  { %v1222_v31 = vmax.f32 %v466_v23, 0.0  ;;  %v469_v33 = vpop.f32.mrb[76].mxu0  ;;  %v1223_v36 = vmax.f32 %v913_v24, 0.0 }
 0x191   :  { %v2050_v37 = vpack.c.bf16 %v1221_v27, %v1217_v26  ;;  %v471_v40 = vpop.f32.mrb[77].mxu0  ;;  %v1224_v41 = vmax.f32 %v915_v28, 0.0  ;;  %v918_v42 = vpop.f32.mrb[76].mxu1  ;;  %v470_v46 = vadd.f32 %v469_v33, %v2806_v32 }
 0x192   :  { %v2048_v43 = vpack.c.bf16 %v1222_v31, %v1218_v29  ;;  %v2178_v44 = vpack.c.bf16 %v1223_v36, %v1219_v30  ;;  %v920_v45 = vpop.f32.mrb[77].mxu1  ;;  %v472_v48 = vadd.f32 %v471_v40, %v2809_v34  ;;  %v919_v50 = vadd.f32 %v918_v42, %v2811_v35 }
 0x193   :  { %v2176_v47 = vpack.c.bf16 %v1224_v41, %v1220_v39  ;;  %v921_v53 = vadd.f32 %v920_v45, %v2813_v38  ;;  %v1225_v58 = vmax.f32 %v470_v46, 0.0 }
 0x194   :  { %v475_v49 = vpop.f32.mrb[78].mxu0  ;;  %2049 = vmatprep.subr.bf16.mxu0 %v2048_v43  ;;  %v1226_v61 = vmax.f32 %v472_v48, 0.0  ;;  %v1227_v62 = vmax.f32 %v919_v50, 0.0 }
 0x195   :  { %v476_v51 = vadd.f32 %v475_v49, %v2806_v32  ;;  %v477_v52 = vpop.f32.mrb[79].mxu0  ;;  %v924_v54 = vpop.f32.mrb[78].mxu1  ;;  %2051 = vmatpush1.bf16.msra.mxu0 %v2050_v37  ;;  %2177 = vmatprep.subr.bf16.mxu1 %v2176_v47  ;;  %v1228_v4 = vmax.f32 %v921_v53, 0.0 }
 0x196   :  { %v478_v55 = vadd.f32 %v477_v52, %v2809_v34  ;;  %v925_v56 = vadd.f32 %v924_v54, %v2811_v35  ;;  %v926_v57 = vpop.f32.mrb[79].mxu1  ;;  %2179 = vmatpush1.bf16.msra.mxu1 %v2178_v44 }
 0x197   :  { %v1229_v59 = vmax.f32 %v476_v51, 0.0  ;;  %v927_v60 = vadd.f32 %v926_v57, %v2813_v38 }
 0x198   :  { %v1230_v63 = vmax.f32 %v478_v55, 0.0  ;;  %v481_v0 = vpop.f32.mrb[80].mxu0  ;;  %v1231_v1 = vmax.f32 %v925_v56, 0.0 }
 0x199   :  { %v2054_v2 = vpack.c.bf16 %v1229_v59, %v1225_v58  ;;  %v483_v5 = vpop.f32.mrb[81].mxu0  ;;  %v1232_v6 = vmax.f32 %v927_v60, 0.0  ;;  %v930_v7 = vpop.f32.mrb[80].mxu1  ;;  %v482_v10 = vadd.f32 %v481_v0, %v2806_v32 }
 0x19a   :  { %v2052_v8 = vpack.c.bf16 %v1230_v63, %v1226_v61  ;;  %v2182_v3 = vpack.c.bf16 %v1231_v1, %v1227_v62  ;;  %v932_v9 = vpop.f32.mrb[81].mxu1  ;;  %v484_v12 = vadd.f32 %v483_v5, %v2809_v34  ;;  %v931_v14 = vadd.f32 %v930_v7, %v2811_v35 }
 0x19b   :  { %v2180_v11 = vpack.c.bf16 %v1232_v6, %v1228_v4  ;;  %v933_v17 = vadd.f32 %v932_v9, %v2813_v38  ;;  %v1233_v22 = vmax.f32 %v482_v10, 0.0 }
 0x19c   :  { %v487_v13 = vpop.f32.mrb[82].mxu0  ;;  %2053 = vmatprep.subr.bf16.mxu0 %v2052_v8  ;;  %v1234_v25 = vmax.f32 %v484_v12, 0.0  ;;  %v1235_v26 = vmax.f32 %v931_v14, 0.0 }
 0x19d   :  { %v488_v15 = vadd.f32 %v487_v13, %v2806_v32  ;;  %v489_v16 = vpop.f32.mrb[83].mxu0  ;;  %v936_v18 = vpop.f32.mrb[82].mxu1  ;;  %2055 = vmatpush1.bf16.msra.mxu0 %v2054_v2  ;;  %2181 = vmatprep.subr.bf16.mxu1 %v2180_v11  ;;  %v1236_v31 = vmax.f32 %v933_v17, 0.0 }
 0x19e   :  { %v490_v19 = vadd.f32 %v489_v16, %v2809_v34  ;;  %v937_v20 = vadd.f32 %v936_v18, %v2811_v35  ;;  %v938_v21 = vpop.f32.mrb[83].mxu1  ;;  %2183 = vmatpush1.bf16.msra.mxu1 %v2182_v3 }
 0x19f   :  { %v1237_v23 = vmax.f32 %v488_v15, 0.0  ;;  %v939_v24 = vadd.f32 %v938_v21, %v2813_v38 }
 0x1a0   :  { %v1238_v27 = vmax.f32 %v490_v19, 0.0  ;;  %v493_v28 = vpop.f32.mrb[84].mxu0  ;;  %v1239_v29 = vmax.f32 %v937_v20, 0.0 }
 0x1a1   :  { %v2058_v30 = vpack.c.bf16 %v1237_v23, %v1233_v22  ;;  %v495_v33 = vpop.f32.mrb[85].mxu0  ;;  %v1240_v36 = vmax.f32 %v939_v24, 0.0  ;;  %v942_v37 = vpop.f32.mrb[84].mxu1  ;;  %v494_v42 = vadd.f32 %v493_v28, %v2806_v32 }
 0x1a2   :  { %v2056_v39 = vpack.c.bf16 %v1238_v27, %v1234_v25  ;;  %v2186_v40 = vpack.c.bf16 %v1239_v29, %v1235_v26  ;;  %v944_v41 = vpop.f32.mrb[85].mxu1  ;;  %v496_v44 = vadd.f32 %v495_v33, %v2809_v34  ;;  %v943_v46 = vadd.f32 %v942_v37, %v2811_v35 }
 0x1a3   :  { %v2184_v43 = vpack.c.bf16 %v1240_v36, %v1236_v31  ;;  %v945_v49 = vadd.f32 %v944_v41, %v2813_v38  ;;  %v1241_v54 = vmax.f32 %v494_v42, 0.0 }
 0x1a4   :  { %v499_v45 = vpop.f32.mrb[86].mxu0  ;;  %2057 = vmatprep.subr.bf16.mxu0 %v2056_v39  ;;  %v1242_v57 = vmax.f32 %v496_v44, 0.0  ;;  %v1243_v58 = vmax.f32 %v943_v46, 0.0 }
 0x1a5   :  { %v500_v47 = vadd.f32 %v499_v45, %v2806_v32  ;;  %v501_v48 = vpop.f32.mrb[87].mxu0  ;;  %v948_v50 = vpop.f32.mrb[86].mxu1  ;;  %2059 = vmatpush1.bf16.msra.mxu0 %v2058_v30  ;;  %2185 = vmatprep.subr.bf16.mxu1 %v2184_v43  ;;  %v1244_v63 = vmax.f32 %v945_v49, 0.0 }
 0x1a6   :  { %v502_v51 = vadd.f32 %v501_v48, %v2809_v34  ;;  %v949_v52 = vadd.f32 %v948_v50, %v2811_v35  ;;  %v950_v53 = vpop.f32.mrb[87].mxu1  ;;  %2187 = vmatpush1.bf16.msra.mxu1 %v2186_v40 }
 0x1a7   :  { %v1245_v55 = vmax.f32 %v500_v47, 0.0  ;;  %v951_v56 = vadd.f32 %v950_v53, %v2813_v38 }
 0x1a8   :  { %v1246_v59 = vmax.f32 %v502_v51, 0.0  ;;  %v505_v60 = vpop.f32.mrb[88].mxu0  ;;  %v1247_v61 = vmax.f32 %v949_v52, 0.0 }
 0x1a9   :  { %v2062_v62 = vpack.c.bf16 %v1245_v55, %v1241_v54  ;;  %v507_v0 = vpop.f32.mrb[89].mxu0  ;;  %v1248_v1 = vmax.f32 %v951_v56, 0.0  ;;  %v954_v2 = vpop.f32.mrb[88].mxu1  ;;  %v506_v7 = vadd.f32 %v505_v60, %v2806_v32 }
 0x1aa   :  { %v2060_v4 = vpack.c.bf16 %v1246_v59, %v1242_v57  ;;  %v2190_v5 = vpack.c.bf16 %v1247_v61, %v1243_v58  ;;  %v956_v6 = vpop.f32.mrb[89].mxu1  ;;  %v508_v3 = vadd.f32 %v507_v0, %v2809_v34  ;;  %v955_v10 = vadd.f32 %v954_v2, %v2811_v35 }
 0x1ab   :  { %v2188_v8 = vpack.c.bf16 %v1248_v1, %v1244_v63  ;;  %v957_v13 = vadd.f32 %v956_v6, %v2813_v38  ;;  %v1249_v18 = vmax.f32 %v506_v7, 0.0 }
 0x1ac   :  { %v511_v9 = vpop.f32.mrb[90].mxu0  ;;  %2061 = vmatprep.subr.bf16.mxu0 %v2060_v4  ;;  %v1250_v21 = vmax.f32 %v508_v3, 0.0  ;;  %v1251_v22 = vmax.f32 %v955_v10, 0.0 }
 0x1ad   :  { %v512_v11 = vadd.f32 %v511_v9, %v2806_v32  ;;  %v513_v12 = vpop.f32.mrb[91].mxu0  ;;  %v960_v14 = vpop.f32.mrb[90].mxu1  ;;  %2063 = vmatpush1.bf16.msra.mxu0 %v2062_v62  ;;  %2189 = vmatprep.subr.bf16.mxu1 %v2188_v8  ;;  %v1252_v27 = vmax.f32 %v957_v13, 0.0 }
 0x1ae   :  { %v514_v15 = vadd.f32 %v513_v12, %v2809_v34  ;;  %v961_v16 = vadd.f32 %v960_v14, %v2811_v35  ;;  %v962_v17 = vpop.f32.mrb[91].mxu1  ;;  %2191 = vmatpush1.bf16.msra.mxu1 %v2190_v5 }
 0x1af   :  { %v1253_v19 = vmax.f32 %v512_v11, 0.0  ;;  %v963_v20 = vadd.f32 %v962_v17, %v2813_v38 }
 0x1b0   :  { %v1254_v23 = vmax.f32 %v514_v15, 0.0  ;;  %v517_v24 = vpop.f32.mrb[92].mxu0  ;;  %v1255_v25 = vmax.f32 %v961_v16, 0.0 }
 0x1b1   :  { %v2066_v26 = vpack.c.bf16 %v1253_v19, %v1249_v18  ;;  %v519_v28 = vpop.f32.mrb[93].mxu0  ;;  %v1256_v29 = vmax.f32 %v963_v20, 0.0  ;;  %v966_v30 = vpop.f32.mrb[92].mxu1  ;;  %v518_v37 = vadd.f32 %v517_v24, %v2806_v32 }
 0x1b2   :  { %v2064_v31 = vpack.c.bf16 %v1254_v23, %v1250_v21  ;;  %v2194_v33 = vpack.c.bf16 %v1255_v25, %v1251_v22  ;;  %v968_v36 = vpop.f32.mrb[93].mxu1  ;;  %v520_v40 = vadd.f32 %v519_v28, %v2809_v34  ;;  %v967_v42 = vadd.f32 %v966_v30, %v2811_v35 }
 0x1b3   :  { %v2192_v39 = vpack.c.bf16 %v1256_v29, %v1252_v27  ;;  %v969_v45 = vadd.f32 %v968_v36, %v2813_v38  ;;  %v1257_v50 = vmax.f32 %v518_v37, 0.0 }
 0x1b4   :  { %v523_v41 = vpop.f32.mrb[94].mxu0  ;;  %2065 = vmatprep.subr.bf16.mxu0 %v2064_v31  ;;  %v1258_v53 = vmax.f32 %v520_v40, 0.0  ;;  %v1259_v54 = vmax.f32 %v967_v42, 0.0 }
 0x1b5   :  { %v524_v43 = vadd.f32 %v523_v41, %v2806_v32  ;;  %v525_v44 = vpop.f32.mrb[95].mxu0  ;;  %v972_v46 = vpop.f32.mrb[94].mxu1  ;;  %2067 = vmatpush1.bf16.msra.mxu0 %v2066_v26  ;;  %2193 = vmatprep.subr.bf16.mxu1 %v2192_v39  ;;  %v1260_v59 = vmax.f32 %v969_v45, 0.0 }
 0x1b6   :  { %v526_v47 = vadd.f32 %v525_v44, %v2809_v34  ;;  %v973_v48 = vadd.f32 %v972_v46, %v2811_v35  ;;  %v974_v49 = vpop.f32.mrb[95].mxu1  ;;  %2195 = vmatpush1.bf16.msra.mxu1 %v2194_v33 }
 0x1b7   :  { %v1261_v51 = vmax.f32 %v524_v43, 0.0  ;;  %v975_v52 = vadd.f32 %v974_v49, %v2813_v38 }
 0x1b8   :  { %v1262_v55 = vmax.f32 %v526_v47, 0.0  ;;  %v529_v56 = vpop.f32.mrb[96].mxu0  ;;  %v1263_v57 = vmax.f32 %v973_v48, 0.0 }
 0x1b9   :  { %v2070_v58 = vpack.c.bf16 %v1261_v51, %v1257_v50  ;;  %v531_v60 = vpop.f32.mrb[97].mxu0  ;;  %v1264_v61 = vmax.f32 %v975_v52, 0.0  ;;  %v978_v62 = vpop.f32.mrb[96].mxu1  ;;  %v530_v2 = vadd.f32 %v529_v56, %v2806_v32 }
 0x1ba   :  { %v2068_v63 = vpack.c.bf16 %v1262_v55, %v1258_v53  ;;  %v2198_v0 = vpack.c.bf16 %v1263_v57, %v1259_v54  ;;  %v980_v1 = vpop.f32.mrb[97].mxu1  ;;  %v532_v5 = vadd.f32 %v531_v60, %v2809_v34  ;;  %v979_v7 = vadd.f32 %v978_v62, %v2811_v35 }
 0x1bb   :  { %v2196_v4 = vpack.c.bf16 %v1264_v61, %v1260_v59  ;;  %v981_v9 = vadd.f32 %v980_v1, %v2813_v38  ;;  %v1265_v14 = vmax.f32 %v530_v2, 0.0 }
 0x1bc   :  { %v535_v6 = vpop.f32.mrb[98].mxu0  ;;  %2069 = vmatprep.subr.bf16.mxu0 %v2068_v63  ;;  %v1266_v17 = vmax.f32 %v532_v5, 0.0  ;;  %v1267_v18 = vmax.f32 %v979_v7, 0.0 }
 0x1bd   :  { %v536_v8 = vadd.f32 %v535_v6, %v2806_v32  ;;  %v537_v3 = vpop.f32.mrb[99].mxu0  ;;  %v984_v10 = vpop.f32.mrb[98].mxu1  ;;  %2071 = vmatpush1.bf16.msra.mxu0 %v2070_v58  ;;  %2197 = vmatprep.subr.bf16.mxu1 %v2196_v4  ;;  %v1268_v23 = vmax.f32 %v981_v9, 0.0 }
 0x1be   :  { %v538_v11 = vadd.f32 %v537_v3, %v2809_v34  ;;  %v985_v12 = vadd.f32 %v984_v10, %v2811_v35  ;;  %v986_v13 = vpop.f32.mrb[99].mxu1  ;;  %2199 = vmatpush1.bf16.msra.mxu1 %v2198_v0 }
 0x1bf   :  { %v1269_v15 = vmax.f32 %v536_v8, 0.0  ;;  %v987_v16 = vadd.f32 %v986_v13, %v2813_v38 }
 0x1c0   :  { %v1270_v19 = vmax.f32 %v538_v11, 0.0  ;;  %v541_v20 = vpop.f32.mrb[100].mxu0  ;;  %v1271_v21 = vmax.f32 %v985_v12, 0.0 }
 0x1c1   :  { %v2074_v22 = vpack.c.bf16 %v1269_v15, %v1265_v14  ;;  %v543_v24 = vpop.f32.mrb[101].mxu0  ;;  %v1272_v25 = vmax.f32 %v987_v16, 0.0  ;;  %v990_v26 = vpop.f32.mrb[100].mxu1  ;;  %v542_v30 = vadd.f32 %v541_v20, %v2806_v32 }
 0x1c2   :  { %v2072_v27 = vpack.c.bf16 %v1270_v19, %v1266_v17  ;;  %v2202_v28 = vpack.c.bf16 %v1271_v21, %v1267_v18  ;;  %v992_v29 = vpop.f32.mrb[101].mxu1  ;;  %v544_v33 = vadd.f32 %v543_v24, %v2809_v34  ;;  %v991_v37 = vadd.f32 %v990_v26, %v2811_v35 }
 0x1c3   :  { %v2200_v31 = vpack.c.bf16 %v1272_v25, %v1268_v23  ;;  %v993_v41 = vadd.f32 %v992_v29, %v2813_v38  ;;  %v1273_v46 = vmax.f32 %v542_v30, 0.0 }
 0x1c4   :  { %v547_v36 = vpop.f32.mrb[102].mxu0  ;;  %2073 = vmatprep.subr.bf16.mxu0 %v2072_v27  ;;  %v1274_v49 = vmax.f32 %v544_v33, 0.0  ;;  %v1275_v50 = vmax.f32 %v991_v37, 0.0 }
 0x1c5   :  { %v548_v39 = vadd.f32 %v547_v36, %v2806_v32  ;;  %v549_v40 = vpop.f32.mrb[103].mxu0  ;;  %v996_v42 = vpop.f32.mrb[102].mxu1  ;;  %2075 = vmatpush1.bf16.msra.mxu0 %v2074_v22  ;;  %2201 = vmatprep.subr.bf16.mxu1 %v2200_v31  ;;  %v1276_v55 = vmax.f32 %v993_v41, 0.0 }
 0x1c6   :  { %v550_v43 = vadd.f32 %v549_v40, %v2809_v34  ;;  %v997_v44 = vadd.f32 %v996_v42, %v2811_v35  ;;  %v998_v45 = vpop.f32.mrb[103].mxu1  ;;  %2203 = vmatpush1.bf16.msra.mxu1 %v2202_v28 }
 0x1c7   :  { %v1277_v47 = vmax.f32 %v548_v39, 0.0  ;;  %v999_v48 = vadd.f32 %v998_v45, %v2813_v38 }
 0x1c8   :  { %v1278_v51 = vmax.f32 %v550_v43, 0.0  ;;  %v553_v52 = vpop.f32.mrb[104].mxu0  ;;  %v1279_v53 = vmax.f32 %v997_v44, 0.0 }
 0x1c9   :  { %v2078_v54 = vpack.c.bf16 %v1277_v47, %v1273_v46  ;;  %v555_v56 = vpop.f32.mrb[105].mxu0  ;;  %v1280_v57 = vmax.f32 %v999_v48, 0.0  ;;  %v1002_v58 = vpop.f32.mrb[104].mxu1  ;;  %v554_v62 = vadd.f32 %v553_v52, %v2806_v32 }
 0x1ca   :  { %v2076_v59 = vpack.c.bf16 %v1278_v51, %v1274_v49  ;;  %v2206_v60 = vpack.c.bf16 %v1279_v53, %v1275_v50  ;;  %v1004_v61 = vpop.f32.mrb[105].mxu1  ;;  %v556_v0 = vadd.f32 %v555_v56, %v2809_v34  ;;  %v1003_v2 = vadd.f32 %v1002_v58, %v2811_v35 }
 0x1cb   :  { %v2204_v63 = vpack.c.bf16 %v1280_v57, %v1276_v55  ;;  %v1005_v6 = vadd.f32 %v1004_v61, %v2813_v38  ;;  %v1281_v10 = vmax.f32 %v554_v62, 0.0 }
 0x1cc   :  { %v559_v1 = vpop.f32.mrb[106].mxu0  ;;  %2077 = vmatprep.subr.bf16.mxu0 %v2076_v59  ;;  %v1282_v13 = vmax.f32 %v556_v0, 0.0  ;;  %v1283_v14 = vmax.f32 %v1003_v2, 0.0 }
 0x1cd   :  { %v560_v4 = vadd.f32 %v559_v1, %v2806_v32  ;;  %v561_v5 = vpop.f32.mrb[107].mxu0  ;;  %v1008_v7 = vpop.f32.mrb[106].mxu1  ;;  %2079 = vmatpush1.bf16.msra.mxu0 %v2078_v54  ;;  %2205 = vmatprep.subr.bf16.mxu1 %v2204_v63  ;;  %v1284_v19 = vmax.f32 %v1005_v6, 0.0 }
 0x1ce   :  { %v562_v8 = vadd.f32 %v561_v5, %v2809_v34  ;;  %v1009_v3 = vadd.f32 %v1008_v7, %v2811_v35  ;;  %v1010_v9 = vpop.f32.mrb[107].mxu1  ;;  %2207 = vmatpush1.bf16.msra.mxu1 %v2206_v60 }
 0x1cf   :  { %v1285_v11 = vmax.f32 %v560_v4, 0.0  ;;  %v1011_v12 = vadd.f32 %v1010_v9, %v2813_v38 }
 0x1d0   :  { %v1286_v15 = vmax.f32 %v562_v8, 0.0  ;;  %v565_v16 = vpop.f32.mrb[108].mxu0  ;;  %v1287_v17 = vmax.f32 %v1009_v3, 0.0 }
 0x1d1   :  { %v2082_v18 = vpack.c.bf16 %v1285_v11, %v1281_v10  ;;  %v567_v20 = vpop.f32.mrb[109].mxu0  ;;  %v1288_v21 = vmax.f32 %v1011_v12, 0.0  ;;  %v1014_v22 = vpop.f32.mrb[108].mxu1  ;;  %v566_v26 = vadd.f32 %v565_v16, %v2806_v32 }
 0x1d2   :  { %v2080_v23 = vpack.c.bf16 %v1286_v15, %v1282_v13  ;;  %v2210_v24 = vpack.c.bf16 %v1287_v17, %v1283_v14  ;;  %v1016_v25 = vpop.f32.mrb[109].mxu1  ;;  %v568_v28 = vadd.f32 %v567_v20, %v2809_v34  ;;  %v1015_v30 = vadd.f32 %v1014_v22, %v2811_v35 }
 0x1d3   :  { %v2208_v27 = vpack.c.bf16 %v1288_v21, %v1284_v19  ;;  %v1017_v36 = vadd.f32 %v1016_v25, %v2813_v38  ;;  %v1289_v42 = vmax.f32 %v566_v26, 0.0 }
 0x1d4   :  { %v571_v29 = vpop.f32.mrb[110].mxu0  ;;  %2081 = vmatprep.subr.bf16.mxu0 %v2080_v23  ;;  %v1290_v45 = vmax.f32 %v568_v28, 0.0  ;;  %v1291_v46 = vmax.f32 %v1015_v30, 0.0 }
 0x1d5   :  { %v572_v31 = vadd.f32 %v571_v29, %v2806_v32  ;;  %v573_v33 = vpop.f32.mrb[111].mxu0  ;;  %v1020_v37 = vpop.f32.mrb[110].mxu1  ;;  %2083 = vmatpush1.bf16.msra.mxu0 %v2082_v18  ;;  %2209 = vmatprep.subr.bf16.mxu1 %v2208_v27  ;;  %v1292_v50 = vmax.f32 %v1017_v36, 0.0 }
 0x1d6   :  { %v574_v39 = vadd.f32 %v573_v33, %v2809_v34  ;;  %v1021_v40 = vadd.f32 %v1020_v37, %v2811_v35  ;;  %v1022_v41 = vpop.f32.mrb[111].mxu1  ;;  %2211 = vmatpush1.bf16.msra.mxu1 %v2210_v24 }
 0x1d7   :  { %v1293_v43 = vmax.f32 %v572_v31, 0.0  ;;  %v1023_v44 = vadd.f32 %v1022_v41, %v2813_v38 }
 0x1d8   :  { %v1294_v47 = vmax.f32 %v574_v39, 0.0  ;;  %v1295_v48 = vmax.f32 %v1021_v40, 0.0 }
 0x1d9   :  { %v2086_v49 = vpack.c.bf16 %v1293_v43, %v1289_v42  ;;  %v577_v51 = vpop.f32.mrb[112].mxu0  ;;  %v1296_v52 = vmax.f32 %v1023_v44, 0.0 }
 0x1da   :  { %v2084_v53 = vpack.c.bf16 %v1294_v47, %v1290_v45  ;;  %v2214_v54 = vpack.c.bf16 %v1295_v48, %v1291_v46  ;;  %v579_v55 = vpop.f32.mrb[113].mxu0  ;;  %v1026_v56 = vpop.f32.mrb[112].mxu1  ;;  %v578_v59 = vadd.f32 %v577_v51, %v2806_v32 }
 0x1db   :  { %v2212_v57 = vpack.c.bf16 %v1296_v52, %v1292_v50  ;;  %v1028_v58 = vpop.f32.mrb[113].mxu1  ;;  %v580_v60 = vadd.f32 %v579_v55, %v2809_v34  ;;  %v1027_v62 = vadd.f32 %v1026_v56, %v2811_v35 }
 0x1dc   :  { %2085 = vmatprep.subr.bf16.mxu0 %v2084_v53  ;;  %v1029_v1 = vadd.f32 %v1028_v58, %v2813_v38  ;;  %v1297_v7 = vmax.f32 %v578_v59, 0.0 }
 0x1dd   :  { %v583_v61 = vpop.f32.mrb[114].mxu0  ;;  %2087 = vmatpush1.bf16.msra.mxu0 %v2086_v49  ;;  %2213 = vmatprep.subr.bf16.mxu1 %v2212_v57  ;;  %v1298_v9 = vmax.f32 %v580_v60, 0.0  ;;  %v1299_v10 = vmax.f32 %v1027_v62, 0.0 }
 0x1de   :  { %v584_v63 = vadd.f32 %v583_v61, %v2806_v32  ;;  %v585_v0 = vpop.f32.mrb[115].mxu0  ;;  %v1032_v2 = vpop.f32.mrb[114].mxu1  ;;  %2215 = vmatpush1.bf16.msra.mxu1 %v2214_v54  ;;  %v1300_v15 = vmax.f32 %v1029_v1, 0.0 }
 0x1df   :  { %v586_v4 = vadd.f32 %v585_v0, %v2809_v34  ;;  %v1033_v5 = vadd.f32 %v1032_v2, %v2811_v35  ;;  %v1034_v6 = vpop.f32.mrb[115].mxu1 }
 0x1e0   :  { %v1301_v8 = vmax.f32 %v584_v63, 0.0  ;;  %v1035_v3 = vadd.f32 %v1034_v6, %v2813_v38 }
 0x1e1   :  { %v1302_v11 = vmax.f32 %v586_v4, 0.0  ;;  %v589_v12 = vpop.f32.mrb[116].mxu0  ;;  %v1303_v13 = vmax.f32 %v1033_v5, 0.0 }
 0x1e2   :  { %v2090_v14 = vpack.c.bf16 %v1301_v8, %v1297_v7  ;;  %v591_v16 = vpop.f32.mrb[117].mxu0  ;;  %v1304_v17 = vmax.f32 %v1035_v3, 0.0  ;;  %v1038_v18 = vpop.f32.mrb[116].mxu1  ;;  %v590_v22 = vadd.f32 %v589_v12, %v2806_v32 }
 0x1e3   :  { %v2088_v19 = vpack.c.bf16 %v1302_v11, %v1298_v9  ;;  %v2218_v20 = vpack.c.bf16 %v1303_v13, %v1299_v10  ;;  %v1040_v21 = vpop.f32.mrb[117].mxu1  ;;  %v592_v24 = vadd.f32 %v591_v16, %v2809_v34  ;;  %v1039_v26 = vadd.f32 %v1038_v18, %v2811_v35 }
 0x1e4   :  { %v2216_v23 = vpack.c.bf16 %v1304_v17, %v1300_v15  ;;  %v1041_v29 = vadd.f32 %v1040_v21, %v2813_v38  ;;  %v1305_v37 = vmax.f32 %v590_v22, 0.0 }
 0x1e5   :  { %v595_v25 = vpop.f32.mrb[118].mxu0  ;;  %2089 = vmatprep.subr.bf16.mxu0 %v2088_v19  ;;  %v1306_v41 = vmax.f32 %v592_v24, 0.0  ;;  %v1307_v42 = vmax.f32 %v1039_v26, 0.0 }
 0x1e6   :  { %v596_v27 = vadd.f32 %v595_v25, %v2806_v32  ;;  %v597_v28 = vpop.f32.mrb[119].mxu0  ;;  %v1044_v30 = vpop.f32.mrb[118].mxu1  ;;  %2091 = vmatpush1.bf16.msra.mxu0 %v2090_v14  ;;  %2217 = vmatprep.subr.bf16.mxu1 %v2216_v23  ;;  %v1308_v47 = vmax.f32 %v1041_v29, 0.0 }
 0x1e7   :  { %v598_v31 = vadd.f32 %v597_v28, %v2809_v34  ;;  %v1045_v33 = vadd.f32 %v1044_v30, %v2811_v35  ;;  %v1046_v36 = vpop.f32.mrb[119].mxu1  ;;  %2219 = vmatpush1.bf16.msra.mxu1 %v2218_v20 }
 0x1e8   :  { %v1309_v39 = vmax.f32 %v596_v27, 0.0  ;;  %v1047_v40 = vadd.f32 %v1046_v36, %v2813_v38  ;;  %v1638_v36 = vld [vmem:[%s3347_s4 + $0x88] sm:$0xff] }
 0x1e9   :  { %v1310_v43 = vmax.f32 %v598_v31, 0.0  ;;  %v601_v44 = vpop.f32.mrb[120].mxu0  ;;  %v1311_v45 = vmax.f32 %v1045_v33, 0.0 }
 0x1ea   :  { %v2094_v46 = vpack.c.bf16 %v1309_v39, %v1305_v37  ;;  %v603_v48 = vpop.f32.mrb[121].mxu0  ;;  %v1312_v49 = vmax.f32 %v1047_v40, 0.0  ;;  %v1050_v50 = vpop.f32.mrb[120].mxu1  ;;  %v602_v54 = vadd.f32 %v601_v44, %v2806_v32 }
 0x1eb   :  { %v2092_v51 = vpack.c.bf16 %v1310_v43, %v1306_v41  ;;  %v2222_v52 = vpack.c.bf16 %v1311_v45, %v1307_v42  ;;  %v1052_v53 = vpop.f32.mrb[121].mxu1  ;;  %v604_v56 = vadd.f32 %v603_v48, %v2809_v34  ;;  %v1051_v58 = vadd.f32 %v1050_v50, %v2811_v35  ;;  %v1622_v48 = vld [vmem:[%s3347_s4 + $0x8] sm:$0xff] }
 0x1ec   :  { %v2220_v55 = vpack.c.bf16 %v1312_v49, %v1308_v47  ;;  %v1053_v61 = vadd.f32 %v1052_v53, %v2813_v38  ;;  %v1313_v2 = vmax.f32 %v602_v54, 0.0  ;;  %v1621_v47 = vld [vmem:[%s3347_s4] sm:$0xff]  ;;  %v1639_v53 = vld [vmem:[%s3347_s4 + $0x90] sm:$0xff]  ;;  %v1640_v54 = vld [vmem:[%s3347_s4 + $0x98] sm:$0xff] }
 0x1ed   :  { %v607_v57 = vpop.f32.mrb[122].mxu0  ;;  %2093 = vmatprep.subr.bf16.mxu0 %v2092_v51  ;;  %v1314_v6 = vmax.f32 %v604_v56, 0.0  ;;  %v1315_v7 = vmax.f32 %v1051_v58, 0.0  ;;  %v1653_v49 = vld [vmem:[%s3347_s4 + $0x100] sm:$0xff]  ;;  %v1672_v56 = vld [vmem:[%s3347_s4 + $0x198] sm:$0xff]  ;;  %v2234_v58 = vpack.c.bf16 %v1622_v48, %v1621_v47  ;;  %v1663_v47 = vld [vmem:[%s3347_s4 + $0x150] sm:$0xff] }
 0x1ee   :  { %v608_v59 = vadd.f32 %v607_v57, %v2806_v32  ;;  %v609_v60 = vpop.f32.mrb[123].mxu0  ;;  %v1056_v62 = vpop.f32.mrb[122].mxu1  ;;  %2095 = vmatpush1.bf16.msra.mxu0 %v2094_v46  ;;  %2221 = vmatprep.subr.bf16.mxu1 %v2220_v55  ;;  %v1316_v11 = vmax.f32 %v1053_v61, 0.0  ;;  %v1671_v55 = vld [vmem:[%s3347_s4 + $0x190] sm:$0xff] }
 0x1ef   :  { %v610_v63 = vadd.f32 %v609_v60, %v2809_v34  ;;  %v1057_v0 = vadd.f32 %v1056_v62, %v2811_v35  ;;  %v1058_v1 = vpop.f32.mrb[123].mxu1  ;;  %2223 = vmatpush1.bf16.msra.mxu1 %v2222_v52  ;;  %v1654_v52 = vld [vmem:[%s3347_s4 + $0x108] sm:$0xff]  ;;  %v1331_v57 = vld [vmem:[%s3346_s3 + $0x10] sm:$0xff]  ;;  %v2236_v60 = vpack.c.bf16 %v1640_v54, %v1639_v53  ;;  %v1624_v62 = vld [vmem:[%s3347_s4 + $0x18] sm:$0xff] }
 0x1f0   :  { %v1317_v4 = vmax.f32 %v608_v59, 0.0  ;;  %v1059_v5 = vadd.f32 %v1058_v1, %v2813_v38  ;;  %v2266_v59 = vpack.c.bf16 %v1654_v52, %v1653_v49  ;;  %v1623_v61 = vld [vmem:[%s3347_s4 + $0x10] sm:$0xff]  ;;  %v1656_v1 = vld [vmem:[%s3347_s4 + $0x118] sm:$0xff]  ;;  %v1681_v52 = vld [vmem:[%s3347_s4 + $0x1e0] sm:$0xff] }
 0x1f1   :  { %v1318_v8 = vmax.f32 %v610_v63, 0.0  ;;  %v613_v3 = vpop.f32.mrb[124].mxu0  ;;  %v1319_v9 = vmax.f32 %v1057_v0, 0.0  ;;  %v1655_v63 = vld [vmem:[%s3347_s4 + $0x110] sm:$0xff]  ;;  %v2268_v0 = vpack.c.bf16 %v1672_v56, %v1671_v55  ;;  %v1664_v49 = vld [vmem:[%s3347_s4 + $0x158] sm:$0xff]  ;;  %v1682_v53 = vld [vmem:[%s3347_s4 + $0x1e8] sm:$0xff] }
 0x1f2   :  { %v2098_v10 = vpack.c.bf16 %v1317_v4, %v1313_v2  ;;  %v615_v12 = vpop.f32.mrb[125].mxu0  ;;  %v1320_v13 = vmax.f32 %v1059_v5, 0.0  ;;  %v1062_v14 = vpop.f32.mrb[124].mxu1  ;;  %v614_v18 = vadd.f32 %v613_v3, %v2806_v32  ;;  %v1641_v2 = vld [vmem:[%s3347_s4 + $0xa0] sm:$0xff]  ;;  %v1642_v4 = vld [vmem:[%s3347_s4 + $0xa8] sm:$0xff]  ;;  %v2286_v55 = vpack.c.bf16 %v1664_v49, %v1663_v47 }
 0x1f3   :  { %v2096_v15 = vpack.c.bf16 %v1318_v8, %v1314_v6  ;;  %v2226_v16 = vpack.c.bf16 %v1319_v9, %v1315_v7  ;;  %v1064_v17 = vpop.f32.mrb[125].mxu1  ;;  %v616_v20 = vadd.f32 %v615_v12, %v2809_v34  ;;  %v1063_v22 = vadd.f32 %v1062_v14, %v2811_v35  ;;  %v1673_v5 = vld [vmem:[%s3347_s4 + $0x1a0] sm:$0xff]  ;;  %v1674_v6 = vld [vmem:[%s3347_s4 + $0x1a8] sm:$0xff]  ;;  %v1643_v14 = vld [vmem:[%s3347_s4 + $0xb0] sm:$0xff] }
 0x1f4   :  { %v2224_v19 = vpack.c.bf16 %v1320_v13, %v1316_v11  ;;  %v1065_v25 = vadd.f32 %v1064_v17, %v2813_v38  ;;  %v1321_v30 = vmax.f32 %v614_v18, 0.0  ;;  %v2238_v7 = vpack.c.bf16 %v1624_v62, %v1623_v61  ;;  %v1625_v9 = vld [vmem:[%s3347_s4 + $0x20] sm:$0xff]  ;;  %v1658_v13 = vld [vmem:[%s3347_s4 + $0x128] sm:$0xff]  ;;  %v1676_v17 = vld [vmem:[%s3347_s4 + $0x1b8] sm:$0xff] }
 0x1f5   :  { %v619_v21 = vpop.f32.mrb[126].mxu0  ;;  %2097 = vmatprep.subr.bf16.mxu0 %v2096_v15  ;;  %v1322_v37 = vmax.f32 %v616_v20, 0.0  ;;  %v1323_v39 = vmax.f32 %v1063_v22, 0.0  ;;  %v2270_v8 = vpack.c.bf16 %v1656_v1, %v1655_v63  ;;  %v2240_v3 = vpack.c.bf16 %v1642_v4, %v1641_v2  ;;  %v1657_v11 = vld [vmem:[%s3347_s4 + $0x120] sm:$0xff]  ;;  %v1644_v15 = vld [vmem:[%s3347_s4 + $0xb8] sm:$0xff]  ;;  %v1666_v61 = vld [vmem:[%s3347_s4 + $0x168] sm:$0xff] }
 0x1f6   :  { %v620_v23 = vadd.f32 %v619_v21, %v2806_v32  ;;  %v621_v24 = vpop.f32.mrb[127].mxu0  ;;  %v1068_v26 = vpop.f32.mrb[126].mxu1  ;;  %2099 = vmatpush1.bf16.msra.mxu0 %v2098_v10  ;;  %2225 = vmatprep.subr.bf16.mxu1 %v2224_v19  ;;  %v1637_v32 = vld [vmem:[%s3347_s4 + $0x80] sm:$0xff]  ;;  %v1324_v42 = vmax.f32 %v1065_v25, 0.0  ;;  %v1626_v10 = vld [vmem:[%s3347_s4 + $0x28] sm:$0xff]  ;;  %v2272_v12 = vpack.c.bf16 %v1674_v6, %v1673_v5  ;;  %v2274_v19 = vpack.c.bf16 %v1658_v13, %v1657_v11  ;;  %v1627_v21 = vld [vmem:[%s3347_s4 + $0x30] sm:$0xff] }
 0x1f7   :  { %v622_v27 = vadd.f32 %v621_v24, %v2809_v34  ;;  %v1069_v28 = vadd.f32 %v1068_v26, %v2811_v35  ;;  %v1070_v29 = vpop.f32.mrb[127].mxu1  ;;  %2227 = vmatpush1.bf16.msra.mxu1 %v2226_v16  ;;  %v1669_v35 = vld [vmem:[%s3347_s4 + $0x180] sm:$0xff]  ;;  %v2232_v46 = vpack.c.bf16 %v1638_v36, %v1637_v32  ;;  %v1675_v16 = vld [vmem:[%s3347_s4 + $0x1b0] sm:$0xff]  ;;  %v2242_v18 = vpack.c.bf16 %v1626_v10, %v1625_v9  ;;  %v1628_v22 = vld [vmem:[%s3347_s4 + $0x38] sm:$0xff] }
 0x1f8   :  { %v1325_v31 = vmax.f32 %v620_v23, 0.0  ;;  %v1071_v33 = vadd.f32 %v1070_v29, %v2813_v38  ;;  %v1670_v38 = vld [vmem:[%s3347_s4 + $0x188] sm:$0xff]  ;;  %v2244_v20 = vpack.c.bf16 %v1644_v15, %v1643_v14  ;;  %v1659_v23 = vld [vmem:[%s3347_s4 + $0x130] sm:$0xff]  ;;  %v2276_v24 = vpack.c.bf16 %v1676_v17, %v1675_v16  ;;  %v1660_v25 = vld [vmem:[%s3347_s4 + $0x138] sm:$0xff] }
 0x1f9   :  { %v1326_v40 = vmax.f32 %v622_v27, 0.0  ;;  %v1327_v34 = vmax.f32 %v1069_v28, 0.0  ;;  %v2264_v51 = vpack.c.bf16 %v1670_v38, %v1669_v35  ;;  %v1645_v26 = vld [vmem:[%s3347_s4 + $0xc0] sm:$0xff]  ;;  %v1646_v27 = vld [vmem:[%s3347_s4 + $0xc8] sm:$0xff]  ;;  %v1648_v35 = vld [vmem:[%s3347_s4 + $0xd8] sm:$0xff] }
 0x1fa   :  { %v2102_v41 = vpack.c.bf16 %v1325_v31, %v1321_v30  ;;  %v1328_v43 = vmax.f32 %v1071_v33, 0.0  ;;  %v1677_v28 = vld [vmem:[%s3347_s4 + $0x1c0] sm:$0xff]  ;;  %v1678_v29 = vld [vmem:[%s3347_s4 + $0x1c8] sm:$0xff]  ;;  %v2246_v30 = vpack.c.bf16 %v1628_v22, %v1627_v21  ;;  %v2278_v31 = vpack.c.bf16 %v1660_v25, %v1659_v23  ;;  %v1679_v38 = vld [vmem:[%s3347_s4 + $0x1d0] sm:$0xff] }
 0x1fb   :  { %v2100_v44 = vpack.c.bf16 %v1326_v40, %v1322_v37  ;;  %v2230_v45 = vpack.c.bf16 %v1327_v34, %v1323_v39  ;;  %v2248_v33 = vpack.c.bf16 %v1646_v27, %v1645_v26  ;;  %v1629_v32 = vld [vmem:[%s3347_s4 + $0x40] sm:$0xff]  ;;  %v1630_v36 = vld [vmem:[%s3347_s4 + $0x48] sm:$0xff]  ;;  %v2280_v39 = vpack.c.bf16 %v1678_v29, %v1677_v28  ;;  %v1647_v34 = vld [vmem:[%s3347_s4 + $0xd0] sm:$0xff] }
 0x1fc   :  { %v2228_v50 = vpack.c.bf16 %v1328_v43, %v1324_v42  ;;  %v1661_v37 = vld [vmem:[%s3347_s4 + $0x140] sm:$0xff]  ;;  %v1662_v40 = vld [vmem:[%s3347_s4 + $0x148] sm:$0xff]  ;;  %v2250_v42 = vpack.c.bf16 %v1630_v36, %v1629_v32  ;;  %v1651_v62 = vld [vmem:[%s3347_s4 + $0xf0] sm:$0xff] }
 0x1fd   :  { %2101 = vmatprep.subr.bf16.mxu0 %v2100_v44  ;;  %v2282_v43 = vpack.c.bf16 %v1662_v40, %v1661_v37  ;;  %v2252_v44 = vpack.c.bf16 %v1648_v35, %v1647_v34  ;;  %v1652_v63 = vld [vmem:[%s3347_s4 + $0xf8] sm:$0xff]  ;;  %v1683_v4 = vld [vmem:[%s3347_s4 + $0x1f0] sm:$0xff]  ;;  %v1841_v17 = vld [vmem:[%s3349_s5] ss:$0 sm:$0xff] }
 0x1fe   :  { %2103 = vmatpush1.bf16.msra.mxu0 %v2102_v41  ;;  %2229 = vmatprep.subr.bf16.mxu1 %v2228_v50  ;;  %v1680_v41 = vld [vmem:[%s3347_s4 + $0x1d8] sm:$0xff]  ;;  %v1649_v50 = vld [vmem:[%s3347_s4 + $0xe0] sm:$0xff]  ;;  %v2260_v2 = vpack.c.bf16 %v1652_v63, %v1651_v62  ;;  %v1635_v6 = vld [vmem:[%s3347_s4 + $0x70] sm:$0xff] }
 0x1ff   :  { %2231 = vmatpush1.bf16.msra.mxu1 %v2230_v45  ;;  %2233 = vmatprep.subr.bf16.mxu0 %v2232_v46  ;;  %v1631_v45 = vld [vmem:[%s3347_s4 + $0x50] sm:$0xff]  ;;  %v1632_v46 = vld [vmem:[%s3347_s4 + $0x58] sm:$0xff]  ;;  %v2284_v48 = vpack.c.bf16 %v1680_v41, %v1679_v38 }
 0x200   :  { %2265 = vmatprep.subr.bf16.mxu1 %v2264_v51  ;;  %v1650_v51 = vld [vmem:[%s3347_s4 + $0xe8] sm:$0xff]  ;;  %v2254_v54 = vpack.c.bf16 %v1632_v46, %v1631_v45  ;;  %v1684_v5 = vld [vmem:[%s3347_s4 + $0x1f8] sm:$0xff] }
 0x201   :  { %1469 = vmatmul.mubr.f32.vlgmr.msra.gmra.mrb[128].mxu0 %v1331_v57  ;;  %v2256_v56 = vpack.c.bf16 %v1650_v51, %v1649_v50  ;;  %v1668_v10 = vld [vmem:[%s3347_s4 + $0x178] sm:$0xff] }
 0x202   :  { %1611 = vmatmul.mubr.f32.vlgmr.msra.gmra.mrb[128].mxu1 %v1331_v57  ;;  %2235 = vmatpush3.bf16.msra.mxu0 %v2234_v58  ;;  %v1633_v57 = vld [vmem:[%s3347_s4 + $0x60] sm:$0xff]  ;;  %v1634_v58 = vld [vmem:[%s3347_s4 + $0x68] sm:$0xff] }
 0x203   :  { %2267 = vmatpush3.bf16.msra.mxu1 %v2266_v59  ;;  %2237 = vmatprep.subr.bf16.mxu0 %v2236_v60  ;;  %v1665_v59 = vld [vmem:[%s3347_s4 + $0x160] sm:$0xff]  ;;  %v2288_v60 = vpack.c.bf16 %v1682_v53, %v1681_v52 }
 0x204   :  { %2269 = vmatprep.subr.bf16.mxu1 %v2268_v0  ;;  %v2258_v0 = vpack.c.bf16 %v1634_v58, %v1633_v57  ;;  %v2290_v1 = vpack.c.bf16 %v1666_v61, %v1665_v59 }
 0x206   :  { %2239 = vmatpush3.bf16.msra.mxu0 %v2238_v7  ;;  %v1636_v7 = vld [vmem:[%s3347_s4 + $0x78] sm:$0xff] }
 0x207   :  { %2271 = vmatpush3.bf16.msra.mxu1 %v2270_v8  ;;  %2241 = vmatprep.subr.bf16.mxu0 %v2240_v3  ;;  %v2292_v8 = vpack.c.bf16 %v1684_v5, %v1683_v4  ;;  %v1667_v3 = vld [vmem:[%s3347_s4 + $0x170] sm:$0xff]  ;;  %v2262_v9 = vpack.c.bf16 %v1636_v7, %v1635_v6 }
 0x208   :  { %2273 = vmatprep.subr.bf16.mxu1 %v2272_v12  ;;  %v2294_v11 = vpack.c.bf16 %v1668_v10, %v1667_v3 }
 0x20a   :  { %2243 = vmatpush3.bf16.msra.mxu0 %v2242_v18 }
 0x20b   :  { %2275 = vmatpush3.bf16.msra.mxu1 %v2274_v19  ;;  %2245 = vmatprep.subr.bf16.mxu0 %v2244_v20 }
 0x20c   :  { %2277 = vmatprep.subr.bf16.mxu1 %v2276_v24 }
 0x20e   :  { %2247 = vmatpush3.bf16.msra.mxu0 %v2246_v30 }
 0x20f   :  { %2279 = vmatpush3.bf16.msra.mxu1 %v2278_v31  ;;  %2249 = vmatprep.subr.bf16.mxu0 %v2248_v33 }
 0x210   :  { %2281 = vmatprep.subr.bf16.mxu1 %v2280_v39 }
 0x212   :  { %2251 = vmatpush3.bf16.msra.mxu0 %v2250_v42 }
 0x213   :  { %2283 = vmatpush3.bf16.msra.mxu1 %v2282_v43  ;;  %2253 = vmatprep.subr.bf16.mxu0 %v2252_v44 }
 0x214   :  { %2285 = vmatprep.subr.bf16.mxu1 %v2284_v48 }
 0x216   :  { %2255 = vmatpush3.bf16.msra.mxu0 %v2254_v54 }
 0x217   :  { %2287 = vmatpush3.bf16.msra.mxu1 %v2286_v55  ;;  %2257 = vmatprep.subr.bf16.mxu0 %v2256_v56 }
 0x218   :  { %2289 = vmatprep.subr.bf16.mxu1 %v2288_v60 }
 0x21a   :  { %2259 = vmatpush3.bf16.msra.mxu0 %v2258_v0 }
 0x21b   :  { %2291 = vmatpush3.bf16.msra.mxu1 %v2290_v1  ;;  %2261 = vmatprep.subr.bf16.mxu0 %v2260_v2 }
 0x21c   :  { %2293 = vmatprep.subr.bf16.mxu1 %v2292_v8 }
 0x21e   :  { %2263 = vmatpush3.bf16.msra.mxu0 %v2262_v9 }
 0x21f   :  { %2295 = vmatpush3.bf16.msra.mxu1 %v2294_v11 }
 0x2d4   :  { %v1470_v12 = vpop.f32.mrb[128].mxu0 }
 0x2d5   :  { %1617 = vst [vmem:[%s3348_s6] sm:$0xff] %v1470_v12  ;;  %v1472_v13 = vpop.f32.mrb[129].mxu0  ;;  %v1612_v14 = vpop.f32.mrb[128].mxu1 }
 0x2d6   :  { %1618 = vst [vmem:[%s3348_s6 + $0x8] sm:$0xff] %v1472_v13  ;;  %1619 = vst [vmem:[%s3348_s6 + $0x10] sm:$0xff] %v1612_v14  ;;  %1756 = vmatprep.mubr.f32.mxu0 %v1472_v13  ;;  %v1614_v15 = vpop.f32.mrb[129].mxu1 }
 0x2d7   :  { %1620 = vst [vmem:[%s3348_s6 + $0x18] sm:$0xff] %v1614_v15  ;;  %1757 = vmatmul.mubr.f32.vlgmr.msra.gmra.mrb[130].mxu0 %v1470_v12  ;;  %1826 = vmatprep.mubr.f32.mxu1 %v1614_v15 }
 0x2d8   :  { %1827 = vmatmul.mubr.f32.vlgmr.msra.gmra.mrb[130].mxu1 %v1612_v14 }
 0x3aa   :  { %v1874_v16 = vpop.f32.mrb[130].mxu0 }
 0x3ab   :  { %v1875_v18 = vpop.f32.mrb[131].mxu0  ;;  %v1909_v19 = vpop.f32.mrb[130].mxu1 }
 0x3ac   :  { %v1876_v20 = vadd.f32 %v1875_v18, %v1874_v16  ;;  %v1910_v21 = vpop.f32.mrb[131].mxu1 }
 0x3ad   :  { %v1911_v22 = vadd.f32 %v1910_v21, %v1909_v19 }
 0x3ae   :  { %v1759_v23 = vadd.f32 %v1876_v20, %v1841_v17 }
 0x3b0   :  { %v1829_v24 = vadd.f32 %v1911_v22, %v1759_v23 }
 0x3b2   :  { %1832 = vst [vmem:[%s3350_s7] sm:$0xff] %v1829_v24 }

</bundles_post_ra>
